<compile_context>
chip_gen: v7x
topology: tpu7x:2x2x1
jax: 0.10.0
libtpu: 0.0.40
codegen_flags: <defaults>
</compile_context>

<pallas_src>
import numpy as np
import jax
import jax.numpy as jnp
from jax import lax
from jax.experimental import pallas as pl
from jax.experimental.pallas import tpu as pltpu

LEAKY_GAT = 0.2        # GATConv negative_slope
LEAKY_FC = 0.01        # nn.LeakyReLU default
BN_EPS = 1e-5          # nn.BatchNorm1d default eps
BN_SCALE = float(1.0 / np.sqrt(1.0 + BN_EPS))   # eval-mode BN with default stats

HP = 128               # padded hidden / feature dim (lane-dense)

# Row layout of the packed vector array (16, HP):
#   0        : lin1 bias
#   1..3     : gat bias, layer 0..2
#   4..6     : a_dst_ext = W_l @ a_dst_l, layer 0..2
#   7..9     : a_src_ext = W_l @ a_src_l, layer 0..2
#   10..12   : fc1 / fc2 / fc3 bias
#   13..15   : zero padding
_ROW_LIN1B = 0
_ROW_GATB = 1
_ROW_ADST = 4
_ROW_ASRC = 7
_ROW_FC1B = 10
_ROW_FC2B = 11
_ROW_FC3B = 12

# Slot layout of the packed weight array (7, HP, HP):
#   0 : lin1_w, 1..3 : gat W layer 0..2, 4 : fc1_w, 5 : fc2_w, 6 : fc3_w
_W_LIN1 = 0
_W_GAT = 1
_W_FC1 = 4
_W_FC2 = 5
_W_FC3 = 6


def _leaky_relu(x, slope):
    return jnp.where(x >= 0, x, slope * x)


def gat_forward_kernel(x_ref, adj_ref, pool_ref, w_ref, vec_ref, out_ref):
    x = x_ref[...]          # (N, HP)   features zero-padded to 128 lanes
    adj = adj_ref[...]      # (N, N)    adj[i, j] = 1 iff edge j -> i (self loops incl.)
    pool = pool_ref[...]    # (Gp, N)   one-hot pooling, zero-padded rows
    vec = vec_ref[...]      # (16, HP)  packed biases / attention vectors

    # ---- lin1 + SiLU ----
    h = jnp.dot(x, w_ref[_W_LIN1], preferred_element_type=jnp.float32)
    h = h + vec[_ROW_LIN1B:_ROW_LIN1B + 1, :]
    h = h * (1.0 / (1.0 + jnp.exp(-h)))                    # SiLU

    # ---- three GATConv layers ----
    for layer in range(3):
        w = w_ref[_W_GAT + layer]                          # (HP, HP)
        bias = vec[_ROW_GATB + layer:_ROW_GATB + layer + 1, :]
        a_dst = vec[_ROW_ADST + layer:_ROW_ADST + layer + 1, :]   # (1, HP) = W a_dst
        a_src = vec[_ROW_ASRC + layer:_ROW_ASRC + layer + 1, :]   # (1, HP) = W a_src

        # big projection in bf16 on the MXU (f32 accumulate)
        hp = jnp.dot(h.astype(jnp.bfloat16), w.astype(jnp.bfloat16),
                     preferred_element_type=jnp.float32)           # (N, HP)

        # per-node attention terms:  alpha_dst[i] = h_i . (W a_dst),
        #                            alpha_src[j] = h_j . (W a_src)
        alpha_dst = lax.dot_general(h, a_dst, (((1,), (1,)), ((), ())),
                                    preferred_element_type=jnp.float32)  # (N, 1)
        alpha_src = lax.dot_general(a_src, h, (((1,), (1,)), ((), ())),
                                    preferred_element_type=jnp.float32)  # (1, N)

        s = alpha_dst + alpha_src                          # (N, N): s[i, j]
        e = _leaky_relu(s, LEAKY_GAT)
        e = jnp.where(adj > 0, e, -1e30)                   # mask non-edges
        e = e - jnp.max(e, axis=-1, keepdims=True)
        p = jnp.exp(e)                                     # non-edges underflow to 0
        denom = jnp.sum(p, axis=-1, keepdims=True)         # >0: self-loops guaranteed
        alpha = p * pl.reciprocal(denom, approx=True)

        # aggregation in bf16 on the MXU (f32 accumulate)
        h = jnp.dot(alpha.astype(jnp.bfloat16), hp.astype(jnp.bfloat16),
                    preferred_element_type=jnp.float32) + bias
        if layer < 2:
            h = jnp.maximum(h, 0.0)                        # F.relu after gat1, gat2

    # ---- global_add_pool ----
    g = jnp.dot(pool, h, preferred_element_type=jnp.float32)          # (Gp, HP)

    # ---- FC head (eval mode) ----
    y = jnp.dot(g, w_ref[_W_FC1], preferred_element_type=jnp.float32)
    y = y + vec[_ROW_FC1B:_ROW_FC1B + 1, :]
    y = _leaky_relu(y, LEAKY_FC) * BN_SCALE
    y = jnp.dot(y, w_ref[_W_FC2], preferred_element_type=jnp.float32)
    y = y + vec[_ROW_FC2B:_ROW_FC2B + 1, :]
    y = _leaky_relu(y, LEAKY_FC) * BN_SCALE
    y = jnp.dot(y, w_ref[_W_FC3], preferred_element_type=jnp.float32)
    y = y + vec[_ROW_FC3B:_ROW_FC3B + 1, :]
    out_ref[...] = y                                                   # (Gp, HP)


def _pad2(a, rows, cols):
    a = jnp.asarray(a, jnp.float32)
    return jnp.pad(a, ((0, rows - a.shape[0]), (0, cols - a.shape[1])))


def pack_params(params):
    """Pack all model parameters into one weight stack + one vector stack."""
    w_list = [
        _pad2(params["lin1_w"], HP, HP),
        _pad2(params["gat_w"][0], HP, HP),
        _pad2(params["gat_w"][1], HP, HP),
        _pad2(params["gat_w"][2], HP, HP),
        _pad2(params["fc1_w"], HP, HP),
        _pad2(params["fc2_w"], HP, HP),
        _pad2(params["fc3_w"], HP, HP),
    ]
    w_pack = jnp.stack(w_list, axis=0)                     # (7, HP, HP)

    rows = [_pad2(params["lin1_b"], 1, HP)]
    for l in range(3):
        rows.append(_pad2(params["gat_b"][l], 1, HP))
    for l in range(3):   # a_dst_ext = W_l @ a_dst_l  -> row
        a_dst_ext = params["gat_w"][l] @ params["gat_adst"][l]         # (H, 1)
        rows.append(_pad2(a_dst_ext.T, 1, HP))
    for l in range(3):   # a_src_ext = W_l @ a_src_l  -> row
        a_src_ext = params["gat_w"][l] @ params["gat_asrc"][l].T       # (H, 1)
        rows.append(_pad2(a_src_ext.T, 1, HP))
    rows.append(_pad2(params["fc1_b"], 1, HP))
    rows.append(_pad2(params["fc2_b"], 1, HP))
    rows.append(_pad2(params["fc3_b"], 1, HP))
    rows.append(jnp.zeros((16 - len(rows), HP), jnp.float32))          # pad to 16 rows
    vec_pack = jnp.concatenate(rows, axis=0)               # (16, HP)
    return w_pack, vec_pack


def gat_forward(x, adj, pool, params):
    N, din = x.shape
    G = pool.shape[0]
    hidden = params["lin1_w"].shape[1]
    assert din <= HP and hidden <= HP

    gp = max(8, ((G + 7) // 8) * 8)                        # sublane-aligned pooled rows
    x_pad = _pad2(x, N, HP)                                # lane-dense features
    pool_pad = _pad2(pool, gp, N)
    w_pack, vec_pack = pack_params(params)

    vmem_spec = pl.BlockSpec(memory_space=pltpu.MemorySpace.VMEM)
    out = pl.pallas_call(
        gat_forward_kernel,
        out_shape=jax.ShapeDtypeStruct((gp, HP), jnp.float32),
        in_specs=[vmem_spec] * 5,
        out_specs=vmem_spec,
        compiler_params=pltpu.CompilerParams(vmem_limit_bytes=16 << 20),
    )(x_pad, jnp.asarray(adj, jnp.float32), pool_pad, w_pack, vec_pack)
    return out[:G, 0]                                      # matches x.view(-1)


def build_graph(num_graphs=2, nodes_per_graph=32, input_dim=16, seed=0):
    N = num_graphs * nodes_per_graph
    key = jax.random.PRNGKey(seed)
    kx, _ = jax.random.split(key)
    x = jax.random.normal(kx, (N, input_dim), dtype=jnp.float32)

    # deterministic edge list (no duplicates, no self loops), both directions
    src, dst = [], []
    for g in range(num_graphs):
        base = g * nodes_per_graph
        for k in range(nodes_per_graph):
            a = base + k
            b = base + (k + 1) % nodes_per_graph
            c = base + (k + 3) % nodes_per_graph
            src += [a, b, a, c]
            dst += [b, a, c, a]
    src = np.array(src); dst = np.array(dst)

    # dense adjacency: adj[dst, src] = 1, plus self loops (GATConv add_self_loops)
    adj = np.zeros((N, N), dtype=np.float32)
    adj[dst, src] = 1.0
    adj = np.maximum(adj, np.eye(N, dtype=np.float32))

    # batch assignment -> one-hot pooling matrix [G, N]
    batch = np.repeat(np.arange(num_graphs), nodes_per_graph)
    pool = (batch[None, :] == np.arange(num_graphs)[:, None]).astype(np.float32)
    return x, jnp.asarray(adj), jnp.asarray(pool)


def init_params(input_dim, hidden, seed=0):
    key = jax.random.PRNGKey(seed + 1)
    ks = jax.random.split(key, 16)

    def init(k, shape, scale=0.1):
        return jax.random.normal(k, shape, dtype=jnp.float32) * scale

    params = {
        "lin1_w": init(ks[0], (input_dim, hidden)),
        "lin1_b": init(ks[1], (1, hidden)),
        # 3 stacked GATConv layers
        "gat_w":    init(ks[2], (3, hidden, hidden)),
        "gat_asrc": init(ks[3], (3, 1, hidden)),
        "gat_adst": init(ks[4], (3, hidden, 1)),
        "gat_b":    init(ks[5], (3, 1, hidden)),
        # FC head
        "fc1_w": init(ks[6], (hidden, hidden)),
        "fc1_b": init(ks[7], (1, hidden)),
        "fc2_w": init(ks[8], (hidden, hidden)),
        "fc2_b": init(ks[9], (1, hidden)),
        "fc3_w": init(ks[10], (hidden, 1)),
        "fc3_b": init(ks[11], (1, 1)),
    }
    return params


if __name__ == "__main__":
    INPUT_DIM = 16
    HIDDEN = 32
    NUM_GRAPHS = 2
    NODES_PER_GRAPH = 32

    x, adj, pool = build_graph(NUM_GRAPHS, NODES_PER_GRAPH, INPUT_DIM, seed=0)
    params = init_params(INPUT_DIM, HIDDEN, seed=0)

    out = gat_forward(x, adj, pool, params)
    out = jax.block_until_ready(out)
    assert out.shape == (NUM_GRAPHS,)
    assert bool(jnp.all(jnp.isfinite(out)))
    print("KERNEL_OK")
</pallas_src>

<mosaic_0001>
module attributes {stable_mosaic.version = 11 : i64} {
  func.func @gat_forward_kernel(%arg0: memref<64x128xf32, #tpu.memory_space<vmem>>, %arg1: memref<64x64xf32, #tpu.memory_space<vmem>>, %arg2: memref<8x64xf32, #tpu.memory_space<vmem>>, %arg3: memref<7x128x128xf32, #tpu.memory_space<vmem>>, %arg4: memref<16x128xf32, #tpu.memory_space<vmem>>, %arg5: memref<8x128xf32, #tpu.memory_space<vmem>>) attributes {dimension_semantics = [], scalar_prefetch = 0 : i64, scratch_operands = 0 : i64, tpu.core_type = #tpu.core_type<tc>} {
    %c0 = arith.constant 0 : index
    %c0_0 = arith.constant 0 : index
    %0 = vector.load %arg0[%c0, %c0_0] : memref<64x128xf32, #tpu.memory_space<vmem>>, vector<64x128xf32>
    %c0_1 = arith.constant 0 : index
    %c0_2 = arith.constant 0 : index
    %1 = vector.load %arg1[%c0_1, %c0_2] : memref<64x64xf32, #tpu.memory_space<vmem>>, vector<64x64xf32>
    %c0_3 = arith.constant 0 : index
    %c0_4 = arith.constant 0 : index
    %2 = vector.load %arg2[%c0_3, %c0_4] : memref<8x64xf32, #tpu.memory_space<vmem>>, vector<8x64xf32>
    %c0_5 = arith.constant 0 : index
    %c0_6 = arith.constant 0 : index
    %3 = vector.load %arg4[%c0_5, %c0_6] : memref<16x128xf32, #tpu.memory_space<vmem>>, vector<16x128xf32>
    %c0_7 = arith.constant 0 : index
    %c0_8 = arith.constant 0 : index
    %c0_9 = arith.constant 0 : index
    %4 = vector.load %arg3[%c0_7, %c0_8, %c0_9] : memref<7x128x128xf32, #tpu.memory_space<vmem>>, vector<1x128x128xf32>
    %5 = vector.shape_cast %4 : vector<1x128x128xf32> to vector<128x128xf32>
    %cst = arith.constant dense<0.000000e+00> : vector<64x128xf32>
    %6 = tpu.matmul %0, %5, %cst {dimension_numbers = #tpu.dot_dimension_numbers<[1], [0], [0], [1], [0, 0, 1, 1], [], []>} : vector<64x128xf32>, vector<128x128xf32>, vector<64x128xf32> -> vector<64x128xf32>
    %7 = vector.extract_strided_slice %3 {offsets = [0, 0], sizes = [1, 128], strides = [1, 1]} : vector<16x128xf32> to vector<1x128xf32>
    %8 = vector.broadcast %7 : vector<1x128xf32> to vector<64x128xf32>
    %9 = arith.addf %6, %8 : vector<64x128xf32>
    %cst_10 = arith.constant 0.000000e+00 : f32
    %10 = vector.broadcast %cst_10 : f32 to vector<64x128xf32>
    %11 = arith.subf %10, %9 : vector<64x128xf32>
    %12 = math.exp %11 : vector<64x128xf32>
    %cst_11 = arith.constant 1.000000e+00 : f32
    %13 = vector.broadcast %cst_11 : f32 to vector<64x128xf32>
    %14 = arith.addf %13, %12 : vector<64x128xf32>
    %cst_12 = arith.constant 1.000000e+00 : f32
    %15 = vector.broadcast %cst_12 : f32 to vector<64x128xf32>
    %16 = arith.divf %15, %14 : vector<64x128xf32>
    %17 = arith.mulf %9, %16 : vector<64x128xf32>
    %c1 = arith.constant 1 : index
    %c0_13 = arith.constant 0 : index
    %c0_14 = arith.constant 0 : index
    %18 = vector.load %arg3[%c1, %c0_13, %c0_14] : memref<7x128x128xf32, #tpu.memory_space<vmem>>, vector<1x128x128xf32>
    %19 = vector.shape_cast %18 : vector<1x128x128xf32> to vector<128x128xf32>
    %20 = vector.extract_strided_slice %3 {offsets = [1, 0], sizes = [1, 128], strides = [1, 1]} : vector<16x128xf32> to vector<1x128xf32>
    %21 = vector.extract_strided_slice %3 {offsets = [4, 0], sizes = [1, 128], strides = [1, 1]} : vector<16x128xf32> to vector<1x128xf32>
    %22 = vector.extract_strided_slice %3 {offsets = [7, 0], sizes = [1, 128], strides = [1, 1]} : vector<16x128xf32> to vector<1x128xf32>
    %23 = arith.truncf %17 : vector<64x128xf32> to vector<64x128xbf16>
    %24 = arith.truncf %19 : vector<128x128xf32> to vector<128x128xbf16>
    %cst_15 = arith.constant dense<0.000000e+00> : vector<64x128xf32>
    %25 = tpu.matmul %23, %24, %cst_15 {dimension_numbers = #tpu.dot_dimension_numbers<[1], [0], [0], [1], [0, 0, 1, 1], [], []>} : vector<64x128xbf16>, vector<128x128xbf16>, vector<64x128xf32> -> vector<64x128xf32>
    %cst_16 = arith.constant dense<0.000000e+00> : vector<64x1xf32>
    %26 = tpu.matmul %17, %21, %cst_16 {dimension_numbers = #tpu.dot_dimension_numbers<[1], [1], [0], [0], [0, 0, 1, 0], [], []>} : vector<64x128xf32>, vector<1x128xf32>, vector<64x1xf32> -> vector<64x1xf32>
    %cst_17 = arith.constant dense<0.000000e+00> : vector<1x64xf32>
    %27 = tpu.matmul %22, %17, %cst_17 {dimension_numbers = #tpu.dot_dimension_numbers<[1], [1], [0], [0], [0, 0, 1, 0], [], []>} : vector<1x128xf32>, vector<64x128xf32>, vector<1x64xf32> -> vector<1x64xf32>
    %28 = vector.broadcast %26 : vector<64x1xf32> to vector<64x64xf32>
    %29 = vector.broadcast %27 : vector<1x64xf32> to vector<64x64xf32>
    %30 = arith.addf %28, %29 : vector<64x64xf32>
    %cst_18 = arith.constant 0.000000e+00 : f32
    %31 = vector.broadcast %cst_18 : f32 to vector<64x64xf32>
    %32 = arith.cmpf oge, %30, %31 : vector<64x64xf32>
    %cst_19 = arith.constant 2.000000e-01 : f32
    %33 = vector.broadcast %cst_19 : f32 to vector<64x64xf32>
    %34 = arith.mulf %33, %30 : vector<64x64xf32>
    %35 = arith.select %32, %30, %34 : vector<64x64xi1>, vector<64x64xf32>
    %cst_20 = arith.constant 0.000000e+00 : f32
    %36 = vector.broadcast %cst_20 : f32 to vector<64x64xf32>
    %37 = arith.cmpf ogt, %1, %36 : vector<64x64xf32>
    %cst_21 = arith.constant -1.000000e+30 : f32
    %38 = vector.broadcast %cst_21 : f32 to vector<64x64xf32>
    %39 = arith.select %37, %35, %38 : vector<64x64xi1>, vector<64x64xf32>
    %cst_22 = arith.constant dense<0xFF800000> : vector<64xf32>
    %40 = vector.multi_reduction <maximumf>, %39, %cst_22 [1] : vector<64x64xf32> to vector<64xf32>
    %41 = vector.shape_cast %40 : vector<64xf32> to vector<64x1xf32>
    %42 = vector.broadcast %41 : vector<64x1xf32> to vector<64x64xf32>
    %43 = arith.subf %39, %42 : vector<64x64xf32>
    %44 = math.exp %43 : vector<64x64xf32>
    %cst_23 = arith.constant dense<0.000000e+00> : vector<64xf32>
    %45 = vector.multi_reduction <add>, %44, %cst_23 [1] : vector<64x64xf32> to vector<64xf32>
    %46 = vector.shape_cast %45 : vector<64xf32> to vector<64x1xf32>
    %47 = tpu.reciprocal %46 {approx = true} : vector<64x1xf32> -> vector<64x1xf32>
    %48 = vector.broadcast %47 : vector<64x1xf32> to vector<64x64xf32>
    %49 = arith.mulf %44, %48 : vector<64x64xf32>
    %50 = arith.truncf %49 : vector<64x64xf32> to vector<64x64xbf16>
    %51 = arith.truncf %25 : vector<64x128xf32> to vector<64x128xbf16>
    %cst_24 = arith.constant dense<0.000000e+00> : vector<64x128xf32>
    %52 = tpu.matmul %50, %51, %cst_24 {dimension_numbers = #tpu.dot_dimension_numbers<[1], [0], [0], [1], [0, 0, 1, 1], [], []>} : vector<64x64xbf16>, vector<64x128xbf16>, vector<64x128xf32> -> vector<64x128xf32>
    %53 = vector.broadcast %20 : vector<1x128xf32> to vector<64x128xf32>
    %54 = arith.addf %52, %53 : vector<64x128xf32>
    %cst_25 = arith.constant 0.000000e+00 : f32
    %55 = vector.broadcast %cst_25 : f32 to vector<64x128xf32>
    %56 = arith.maximumf %54, %55 : vector<64x128xf32>
    %c2 = arith.constant 2 : index
    %c0_26 = arith.constant 0 : index
    %c0_27 = arith.constant 0 : index
    %57 = vector.load %arg3[%c2, %c0_26, %c0_27] : memref<7x128x128xf32, #tpu.memory_space<vmem>>, vector<1x128x128xf32>
    %58 = vector.shape_cast %57 : vector<1x128x128xf32> to vector<128x128xf32>
    %59 = vector.extract_strided_slice %3 {offsets = [2, 0], sizes = [1, 128], strides = [1, 1]} : vector<16x128xf32> to vector<1x128xf32>
    %60 = vector.extract_strided_slice %3 {offsets = [5, 0], sizes = [1, 128], strides = [1, 1]} : vector<16x128xf32> to vector<1x128xf32>
    %61 = vector.extract_strided_slice %3 {offsets = [8, 0], sizes = [1, 128], strides = [1, 1]} : vector<16x128xf32> to vector<1x128xf32>
    %62 = arith.truncf %56 : vector<64x128xf32> to vector<64x128xbf16>
    %63 = arith.truncf %58 : vector<128x128xf32> to vector<128x128xbf16>
    %cst_28 = arith.constant dense<0.000000e+00> : vector<64x128xf32>
    %64 = tpu.matmul %62, %63, %cst_28 {dimension_numbers = #tpu.dot_dimension_numbers<[1], [0], [0], [1], [0, 0, 1, 1], [], []>} : vector<64x128xbf16>, vector<128x128xbf16>, vector<64x128xf32> -> vector<64x128xf32>
    %cst_29 = arith.constant dense<0.000000e+00> : vector<64x1xf32>
    %65 = tpu.matmul %56, %60, %cst_29 {dimension_numbers = #tpu.dot_dimension_numbers<[1], [1], [0], [0], [0, 0, 1, 0], [], []>} : vector<64x128xf32>, vector<1x128xf32>, vector<64x1xf32> -> vector<64x1xf32>
    %cst_30 = arith.constant dense<0.000000e+00> : vector<1x64xf32>
    %66 = tpu.matmul %61, %56, %cst_30 {dimension_numbers = #tpu.dot_dimension_numbers<[1], [1], [0], [0], [0, 0, 1, 0], [], []>} : vector<1x128xf32>, vector<64x128xf32>, vector<1x64xf32> -> vector<1x64xf32>
    %67 = vector.broadcast %65 : vector<64x1xf32> to vector<64x64xf32>
    %68 = vector.broadcast %66 : vector<1x64xf32> to vector<64x64xf32>
    %69 = arith.addf %67, %68 : vector<64x64xf32>
    %cst_31 = arith.constant 0.000000e+00 : f32
    %70 = vector.broadcast %cst_31 : f32 to vector<64x64xf32>
    %71 = arith.cmpf oge, %69, %70 : vector<64x64xf32>
    %cst_32 = arith.constant 2.000000e-01 : f32
    %72 = vector.broadcast %cst_32 : f32 to vector<64x64xf32>
    %73 = arith.mulf %72, %69 : vector<64x64xf32>
    %74 = arith.select %71, %69, %73 : vector<64x64xi1>, vector<64x64xf32>
    %cst_33 = arith.constant 0.000000e+00 : f32
    %75 = vector.broadcast %cst_33 : f32 to vector<64x64xf32>
    %76 = arith.cmpf ogt, %1, %75 : vector<64x64xf32>
    %cst_34 = arith.constant -1.000000e+30 : f32
    %77 = vector.broadcast %cst_34 : f32 to vector<64x64xf32>
    %78 = arith.select %76, %74, %77 : vector<64x64xi1>, vector<64x64xf32>
    %cst_35 = arith.constant dense<0xFF800000> : vector<64xf32>
    %79 = vector.multi_reduction <maximumf>, %78, %cst_35 [1] : vector<64x64xf32> to vector<64xf32>
    %80 = vector.shape_cast %79 : vector<64xf32> to vector<64x1xf32>
    %81 = vector.broadcast %80 : vector<64x1xf32> to vector<64x64xf32>
    %82 = arith.subf %78, %81 : vector<64x64xf32>
    %83 = math.exp %82 : vector<64x64xf32>
    %cst_36 = arith.constant dense<0.000000e+00> : vector<64xf32>
    %84 = vector.multi_reduction <add>, %83, %cst_36 [1] : vector<64x64xf32> to vector<64xf32>
    %85 = vector.shape_cast %84 : vector<64xf32> to vector<64x1xf32>
    %86 = tpu.reciprocal %85 {approx = true} : vector<64x1xf32> -> vector<64x1xf32>
    %87 = vector.broadcast %86 : vector<64x1xf32> to vector<64x64xf32>
    %88 = arith.mulf %83, %87 : vector<64x64xf32>
    %89 = arith.truncf %88 : vector<64x64xf32> to vector<64x64xbf16>
    %90 = arith.truncf %64 : vector<64x128xf32> to vector<64x128xbf16>
    %cst_37 = arith.constant dense<0.000000e+00> : vector<64x128xf32>
    %91 = tpu.matmul %89, %90, %cst_37 {dimension_numbers = #tpu.dot_dimension_numbers<[1], [0], [0], [1], [0, 0, 1, 1], [], []>} : vector<64x64xbf16>, vector<64x128xbf16>, vector<64x128xf32> -> vector<64x128xf32>
    %92 = vector.broadcast %59 : vector<1x128xf32> to vector<64x128xf32>
    %93 = arith.addf %91, %92 : vector<64x128xf32>
    %cst_38 = arith.constant 0.000000e+00 : f32
    %94 = vector.broadcast %cst_38 : f32 to vector<64x128xf32>
    %95 = arith.maximumf %93, %94 : vector<64x128xf32>
    %c3 = arith.constant 3 : index
    %c0_39 = arith.constant 0 : index
    %c0_40 = arith.constant 0 : index
    %96 = vector.load %arg3[%c3, %c0_39, %c0_40] : memref<7x128x128xf32, #tpu.memory_space<vmem>>, vector<1x128x128xf32>
    %97 = vector.shape_cast %96 : vector<1x128x128xf32> to vector<128x128xf32>
    %98 = vector.extract_strided_slice %3 {offsets = [3, 0], sizes = [1, 128], strides = [1, 1]} : vector<16x128xf32> to vector<1x128xf32>
    %99 = vector.extract_strided_slice %3 {offsets = [6, 0], sizes = [1, 128], strides = [1, 1]} : vector<16x128xf32> to vector<1x128xf32>
    %100 = vector.extract_strided_slice %3 {offsets = [9, 0], sizes = [1, 128], strides = [1, 1]} : vector<16x128xf32> to vector<1x128xf32>
    %101 = arith.truncf %95 : vector<64x128xf32> to vector<64x128xbf16>
    %102 = arith.truncf %97 : vector<128x128xf32> to vector<128x128xbf16>
    %cst_41 = arith.constant dense<0.000000e+00> : vector<64x128xf32>
    %103 = tpu.matmul %101, %102, %cst_41 {dimension_numbers = #tpu.dot_dimension_numbers<[1], [0], [0], [1], [0, 0, 1, 1], [], []>} : vector<64x128xbf16>, vector<128x128xbf16>, vector<64x128xf32> -> vector<64x128xf32>
    %cst_42 = arith.constant dense<0.000000e+00> : vector<64x1xf32>
    %104 = tpu.matmul %95, %99, %cst_42 {dimension_numbers = #tpu.dot_dimension_numbers<[1], [1], [0], [0], [0, 0, 1, 0], [], []>} : vector<64x128xf32>, vector<1x128xf32>, vector<64x1xf32> -> vector<64x1xf32>
    %cst_43 = arith.constant dense<0.000000e+00> : vector<1x64xf32>
    %105 = tpu.matmul %100, %95, %cst_43 {dimension_numbers = #tpu.dot_dimension_numbers<[1], [1], [0], [0], [0, 0, 1, 0], [], []>} : vector<1x128xf32>, vector<64x128xf32>, vector<1x64xf32> -> vector<1x64xf32>
    %106 = vector.broadcast %104 : vector<64x1xf32> to vector<64x64xf32>
    %107 = vector.broadcast %105 : vector<1x64xf32> to vector<64x64xf32>
    %108 = arith.addf %106, %107 : vector<64x64xf32>
    %cst_44 = arith.constant 0.000000e+00 : f32
    %109 = vector.broadcast %cst_44 : f32 to vector<64x64xf32>
    %110 = arith.cmpf oge, %108, %109 : vector<64x64xf32>
    %cst_45 = arith.constant 2.000000e-01 : f32
    %111 = vector.broadcast %cst_45 : f32 to vector<64x64xf32>
    %112 = arith.mulf %111, %108 : vector<64x64xf32>
    %113 = arith.select %110, %108, %112 : vector<64x64xi1>, vector<64x64xf32>
    %cst_46 = arith.constant 0.000000e+00 : f32
    %114 = vector.broadcast %cst_46 : f32 to vector<64x64xf32>
    %115 = arith.cmpf ogt, %1, %114 : vector<64x64xf32>
    %cst_47 = arith.constant -1.000000e+30 : f32
    %116 = vector.broadcast %cst_47 : f32 to vector<64x64xf32>
    %117 = arith.select %115, %113, %116 : vector<64x64xi1>, vector<64x64xf32>
    %cst_48 = arith.constant dense<0xFF800000> : vector<64xf32>
    %118 = vector.multi_reduction <maximumf>, %117, %cst_48 [1] : vector<64x64xf32> to vector<64xf32>
    %119 = vector.shape_cast %118 : vector<64xf32> to vector<64x1xf32>
    %120 = vector.broadcast %119 : vector<64x1xf32> to vector<64x64xf32>
    %121 = arith.subf %117, %120 : vector<64x64xf32>
    %122 = math.exp %121 : vector<64x64xf32>
    %cst_49 = arith.constant dense<0.000000e+00> : vector<64xf32>
    %123 = vector.multi_reduction <add>, %122, %cst_49 [1] : vector<64x64xf32> to vector<64xf32>
    %124 = vector.shape_cast %123 : vector<64xf32> to vector<64x1xf32>
    %125 = tpu.reciprocal %124 {approx = true} : vector<64x1xf32> -> vector<64x1xf32>
    %126 = vector.broadcast %125 : vector<64x1xf32> to vector<64x64xf32>
    %127 = arith.mulf %122, %126 : vector<64x64xf32>
    %128 = arith.truncf %127 : vector<64x64xf32> to vector<64x64xbf16>
    %129 = arith.truncf %103 : vector<64x128xf32> to vector<64x128xbf16>
    %cst_50 = arith.constant dense<0.000000e+00> : vector<64x128xf32>
    %130 = tpu.matmul %128, %129, %cst_50 {dimension_numbers = #tpu.dot_dimension_numbers<[1], [0], [0], [1], [0, 0, 1, 1], [], []>} : vector<64x64xbf16>, vector<64x128xbf16>, vector<64x128xf32> -> vector<64x128xf32>
    %131 = vector.broadcast %98 : vector<1x128xf32> to vector<64x128xf32>
    %132 = arith.addf %130, %131 : vector<64x128xf32>
    %cst_51 = arith.constant dense<0.000000e+00> : vector<8x128xf32>
    %133 = tpu.matmul %2, %132, %cst_51 {dimension_numbers = #tpu.dot_dimension_numbers<[1], [0], [0], [1], [0, 0, 1, 1], [], []>} : vector<8x64xf32>, vector<64x128xf32>, vector<8x128xf32> -> vector<8x128xf32>
    %c4 = arith.constant 4 : index
    %c0_52 = arith.constant 0 : index
    %c0_53 = arith.constant 0 : index
    %134 = vector.load %arg3[%c4, %c0_52, %c0_53] : memref<7x128x128xf32, #tpu.memory_space<vmem>>, vector<1x128x128xf32>
    %135 = vector.shape_cast %134 : vector<1x128x128xf32> to vector<128x128xf32>
    %cst_54 = arith.constant dense<0.000000e+00> : vector<8x128xf32>
    %136 = tpu.matmul %133, %135, %cst_54 {dimension_numbers = #tpu.dot_dimension_numbers<[1], [0], [0], [1], [0, 0, 1, 1], [], []>} : vector<8x128xf32>, vector<128x128xf32>, vector<8x128xf32> -> vector<8x128xf32>
    %137 = vector.extract_strided_slice %3 {offsets = [10, 0], sizes = [1, 128], strides = [1, 1]} : vector<16x128xf32> to vector<1x128xf32>
    %138 = vector.broadcast %137 : vector<1x128xf32> to vector<8x128xf32>
    %139 = arith.addf %136, %138 : vector<8x128xf32>
    %cst_55 = arith.constant 0.000000e+00 : f32
    %140 = vector.broadcast %cst_55 : f32 to vector<8x128xf32>
    %141 = arith.cmpf oge, %139, %140 : vector<8x128xf32>
    %cst_56 = arith.constant 0.00999999977 : f32
    %142 = vector.broadcast %cst_56 : f32 to vector<8x128xf32>
    %143 = arith.mulf %142, %139 : vector<8x128xf32>
    %144 = arith.select %141, %139, %143 : vector<8x128xi1>, vector<8x128xf32>
    %cst_57 = arith.constant 0.999994993 : f32
    %145 = vector.broadcast %cst_57 : f32 to vector<8x128xf32>
    %146 = arith.mulf %144, %145 : vector<8x128xf32>
    %c5 = arith.constant 5 : index
    %c0_58 = arith.constant 0 : index
    %c0_59 = arith.constant 0 : index
    %147 = vector.load %arg3[%c5, %c0_58, %c0_59] : memref<7x128x128xf32, #tpu.memory_space<vmem>>, vector<1x128x128xf32>
    %148 = vector.shape_cast %147 : vector<1x128x128xf32> to vector<128x128xf32>
    %cst_60 = arith.constant dense<0.000000e+00> : vector<8x128xf32>
    %149 = tpu.matmul %146, %148, %cst_60 {dimension_numbers = #tpu.dot_dimension_numbers<[1], [0], [0], [1], [0, 0, 1, 1], [], []>} : vector<8x128xf32>, vector<128x128xf32>, vector<8x128xf32> -> vector<8x128xf32>
    %150 = vector.extract_strided_slice %3 {offsets = [11, 0], sizes = [1, 128], strides = [1, 1]} : vector<16x128xf32> to vector<1x128xf32>
    %151 = vector.broadcast %150 : vector<1x128xf32> to vector<8x128xf32>
    %152 = arith.addf %149, %151 : vector<8x128xf32>
    %cst_61 = arith.constant 0.000000e+00 : f32
    %153 = vector.broadcast %cst_61 : f32 to vector<8x128xf32>
    %154 = arith.cmpf oge, %152, %153 : vector<8x128xf32>
    %cst_62 = arith.constant 0.00999999977 : f32
    %155 = vector.broadcast %cst_62 : f32 to vector<8x128xf32>
    %156 = arith.mulf %155, %152 : vector<8x128xf32>
    %157 = arith.select %154, %152, %156 : vector<8x128xi1>, vector<8x128xf32>
    %cst_63 = arith.constant 0.999994993 : f32
    %158 = vector.broadcast %cst_63 : f32 to vector<8x128xf32>
    %159 = arith.mulf %157, %158 : vector<8x128xf32>
    %c6 = arith.constant 6 : index
    %c0_64 = arith.constant 0 : index
    %c0_65 = arith.constant 0 : index
    %160 = vector.load %arg3[%c6, %c0_64, %c0_65] : memref<7x128x128xf32, #tpu.memory_space<vmem>>, vector<1x128x128xf32>
    %161 = vector.shape_cast %160 : vector<1x128x128xf32> to vector<128x128xf32>
    %cst_66 = arith.constant dense<0.000000e+00> : vector<8x128xf32>
    %162 = tpu.matmul %159, %161, %cst_66 {dimension_numbers = #tpu.dot_dimension_numbers<[1], [0], [0], [1], [0, 0, 1, 1], [], []>} : vector<8x128xf32>, vector<128x128xf32>, vector<8x128xf32> -> vector<8x128xf32>
    %163 = vector.extract_strided_slice %3 {offsets = [12, 0], sizes = [1, 128], strides = [1, 1]} : vector<16x128xf32> to vector<1x128xf32>
    %164 = vector.broadcast %163 : vector<1x128xf32> to vector<8x128xf32>
    %165 = arith.addf %162, %164 : vector<8x128xf32>
    %c0_67 = arith.constant 0 : index
    %c0_68 = arith.constant 0 : index
    %166 = vector.load %arg5[%c0_67, %c0_68] : memref<8x128xf32, #tpu.memory_space<vmem>>, vector<8x128xf32>
    tpu.vector_store %arg5[%c0_67, %c0_68], %165 {strides = array<i32>} : memref<8x128xf32, #tpu.memory_space<vmem>>, vector<8x128xf32>,
    return
  }
}

</mosaic_0001>

<bundles_post_ra>
// kernel: tpu_custom_call.1
= control target key start
LH: loop header
LB: loop body
LE: loop exit
PB: predicated region body
PF: predicated region fallthrough
CT: control target
= control target key end

     0   :  { %10 = vsyncpa [#allocation3], 0  ;;  %s3318_s0 = inlined_call_operand.hbm [shape: f32[64,128], index: 0, kind: input, shape index: {}]   ;;  %s3319_s1 = inlined_call_operand.hbm [shape: f32[64,64], index: 1, kind: input, shape index: {}]   ;;  %s3320_s2 = inlined_call_operand.hbm [shape: f32[8,64], index: 2, kind: input, shape index: {}]   ;;  %s3321_s3 = inlined_call_operand.hbm [shape: f32[7,128,128], index: 3, kind: input, shape index: {}]   ;;  %s3322_s4 = inlined_call_operand.hbm [shape: f32[16,128], index: 4, kind: input, shape index: {}]   ;;  %s3323_s5 = inlined_call_operand.hbm [shape: f32[8,128], index: 5, kind: output, shape index: {}]  }
   0x1   :  { %11 = vsyncpa [#allocation6], 0 }
   0x2   :  { %12 = vsyncpa [#allocation9], 0 }
   0x3   :  { %13 = vsyncpa [#allocation4], 0  ;;  %s2892_s18 = smov [#allocation5]   ;;  %s2893_s20 = smov [#allocation8]  }
   0x4   :  { %s31_s19 = sshll.u32 %s2892_s18, 4  ;;  %s53_s21 = sshll.u32 %s2893_s20, 4  ;;  %s32_s19 = int_to_ptr.vmem [resolvable:$true] %s31_s19  ;;  %s2933_s21 = int_to_ptr.vmem [resolvable:$true] %s53_s21 }
   0x5   :  { %s2752_s24 = scalar_lea.hbm %s3319_s1, 1024 }
   0x6   :  { %p2753_p0 = scmp.ne.s32.totalorder %s3319_s1, %s2752_s24  ;;  %p2756_p1 = scmp.lt.u32.totalorder %s2752_s24, %s3319_s1 }
   0x8   :  { %p2758_p2 = pnand %p2756_p1, %p2753_p0 }
   0xa   :  { %2761 = shalt.err (!%p2758_p2)
}
   0xb   :  { %s2762_s29 = scalar_lea.vmem %s32_s19, 1024  ;;  %p2767_p4 = scmp.lt.s32.totalorder %s32_s19, %s32_s19 }
   0xc   :  { %p2763_p3 = scmp.ne.s32.totalorder %s32_s19, %s2762_s29  ;;  %p2768_p5 = scmp.lt.s32.totalorder %s2762_s29, %s2762_s29 }
   0xe   :  { %p2769_p6 = por %p2768_p5, %p2767_p4 }
  0x10   :  { %p2770_p7 = pnand %p2769_p6, %p2763_p3 }
  0x12   :  { %2773 = shalt.err (!%p2770_p7)
}
  0x13   :  { %s2894_s30 = smov 128   ;;  %s2895_s6 = smov 8  }
  0x14   :  { %37 = dma.hbm_to_vmem [thread:$0]  %s3319_s1, 1024, %s32_s19, [#allocation6], %s2894_s30, %s2894_s30, %s2895_s6  }
  0x15   :  { %s2774_s11 = scalar_lea.hbm %s3321_s3, 14336 }
  0x16   :  { %p2775_p8 = scmp.ne.s32.totalorder %s3321_s3, %s2774_s11  ;;  %p2778_p9 = scmp.lt.u32.totalorder %s2774_s11, %s3321_s3 }
  0x18   :  { %p2780_p10 = pnand %p2778_p9, %p2775_p8 }
  0x1a   :  { %2783 = shalt.err (!%p2780_p10)
}
  0x1b   :  { %s2784_s16 = scalar_lea.vmem %s2933_s21, 14336  ;;  %p2789_p12 = scmp.lt.s32.totalorder %s2933_s21, %s2933_s21 }
  0x1c   :  { %p2785_p11 = scmp.ne.s32.totalorder %s2933_s21, %s2784_s16  ;;  %p2790_p13 = scmp.lt.s32.totalorder %s2784_s16, %s2784_s16 }
  0x1e   :  { %p2791_p0 = por %p2790_p13, %p2789_p12 }
  0x20   :  { %p2792_p1 = pnand %p2791_p0, %p2785_p11 }
  0x22   :  { %2795 = shalt.err (!%p2792_p1)
}
  0x23   :  { %59 = dma.hbm_to_vmem [thread:$0]  %s3321_s3, 14336, %s2933_s21, [#allocation9], %s2894_s30, %s2894_s30, %s2895_s6  }
  0x24   :  { %s2896_s18 = smov [#allocation2]   ;;  %s2897_s20 = smov [#allocation7]  }
  0x25   :  { %s19_s19 = sshll.u32 %s2896_s18, 4  ;;  %s44_s22 = sshll.u32 %s2897_s20, 4  ;;  %s20_s19 = int_to_ptr.vmem [resolvable:$true] %s19_s19  ;;  %s45_s22 = int_to_ptr.vmem [resolvable:$true] %s44_s22 }
  0x26   :  { %s2796_s25 = scalar_lea.hbm %s3318_s0, 1024 }
  0x27   :  { %p2797_p2 = scmp.ne.s32.totalorder %s3318_s0, %s2796_s25  ;;  %p2800_p3 = scmp.lt.u32.totalorder %s2796_s25, %s3318_s0 }
  0x29   :  { %p2802_p4 = pnand %p2800_p3, %p2797_p2 }
  0x2b   :  { %2805 = shalt.err (!%p2802_p4)
}
  0x2c   :  { %s2806_s3 = scalar_lea.vmem %s20_s19, 1024  ;;  %p2811_p6 = scmp.lt.s32.totalorder %s20_s19, %s20_s19 }
  0x2d   :  { %p2807_p5 = scmp.ne.s32.totalorder %s20_s19, %s2806_s3  ;;  %p2812_p7 = scmp.lt.s32.totalorder %s2806_s3, %s2806_s3 }
  0x2f   :  { %p2813_p8 = por %p2812_p7, %p2811_p6 }
  0x31   :  { %p2814_p9 = pnand %p2813_p8, %p2807_p5 }
  0x33   :  { %2817 = shalt.err (!%p2814_p9)
}
  0x34   :  { %25 = dma.hbm_to_vmem [thread:$0]  %s3318_s0, 1024, %s20_s19, [#allocation3], %s2894_s30, %s2894_s30, %s2895_s6  }
  0x35   :  { %s2818_s10 = scalar_lea.hbm %s3320_s2, 128 }
  0x36   :  { %p2819_p10 = scmp.ne.s32.totalorder %s3320_s2, %s2818_s10  ;;  %p2822_p11 = scmp.lt.u32.totalorder %s2818_s10, %s3320_s2 }
  0x38   :  { %p2824_p12 = pnand %p2822_p11, %p2819_p10 }
  0x3a   :  { %2827 = shalt.err (!%p2824_p12)
}
  0x3b   :  { %s2828_s15 = scalar_lea.vmem %s45_s22, 128  ;;  %p2833_p0 = scmp.lt.s32.totalorder %s45_s22, %s45_s22 }
  0x3c   :  { %p2829_p13 = scmp.ne.s32.totalorder %s45_s22, %s2828_s15  ;;  %p2834_p1 = scmp.lt.s32.totalorder %s2828_s15, %s2828_s15 }
  0x3e   :  { %p2835_p2 = por %p2834_p1, %p2833_p0 }
  0x40   :  { %p2836_p3 = pnand %p2835_p2, %p2829_p13 }
  0x42   :  { %2839 = shalt.err (!%p2836_p3)
}
  0x43   :  { %47 = dma.hbm_to_vmem [thread:$0]  %s3320_s2, 128, %s45_s22, [#allocation6]  }
  0x44   :  { %s2898_s1 = smov [#allocation10]   ;;  %s2840_s20 = scalar_lea.hbm %s3322_s4, 256 }
  0x45   :  { %s65_s17 = sshll.u32 %s2898_s1, 4  ;;  %p2841_p4 = scmp.ne.s32.totalorder %s3322_s4, %s2840_s20  ;;  %s66_s17 = int_to_ptr.vmem [resolvable:$true] %s65_s17 }
  0x46   :  { %p2844_p5 = scmp.lt.u32.totalorder %s2840_s20, %s3322_s4 }
  0x48   :  { %p2846_p6 = pnand %p2844_p5, %p2841_p4 }
  0x4a   :  { %2849 = shalt.err (!%p2846_p6)
}
  0x4b   :  { %s2850_s27 = scalar_lea.vmem %s66_s17, 256  ;;  %p2855_p8 = scmp.lt.s32.totalorder %s66_s17, %s66_s17 }
  0x4c   :  { %p2851_p7 = scmp.ne.s32.totalorder %s66_s17, %s2850_s27  ;;  %p2856_p9 = scmp.lt.s32.totalorder %s2850_s27, %s2850_s27 }
  0x4e   :  { %p2857_p10 = por %p2856_p9, %p2855_p8 }
  0x50   :  { %p2858_p11 = pnand %p2857_p10, %p2851_p7 }
  0x52   :  { %2861 = shalt.err (!%p2858_p11)
}
  0x53   :  { %71 = dma.hbm_to_vmem [thread:$0]  %s3322_s4, 256, %s66_s17, [#allocation9], %s2894_s30, %s2894_s30, %s2895_s6  }
  0x54   :  { %2884 = dma.done.wait [#allocation3], 1024  }
  0x55   :  { %2885 = vsyncadd [#allocation3], 4294966272 }
  0x56   :  { %2886 = dma.done.wait [#allocation6], 1152  }
  0x57   :  { %2887 = vsyncadd [#allocation6], 4294966144 }
  0x58   :  { %2888 = dma.done.wait [#allocation9], 14592  }
  0x59   :  { %2889 = vsyncadd [#allocation9], 4294952704  ;;  %v107_v0 = vld [vmem:[#allocation8] sm:$0xff]  ;;  %v108_v1 = vld [vmem:[#allocation8 + $0x8] sm:$0xff]  ;;  %v2899_v56 = vmov 0.0|0.0   ;;  %vm2900_vm0 = vmmov 0   ;;  %v123_v58 = vlaneseq }
  0x5a   :  { %v109_v2 = vld [vmem:[#allocation8 + $0x10] sm:$0xff]  ;;  %v2459_v3 = vpack.c.bf16 %v108_v1, %v107_v0  ;;  %v110_v4 = vld [vmem:[#allocation8 + $0x18] sm:$0xff]  ;;  %v111_v6 = vld [vmem:[#allocation8 + $0x20] sm:$0xff]  ;;  %v2901_v57 = vmov 0.0   ;;  %vm535_vm2 = vcmask 523264   ;;  %s2902_s4 = smov [#allocation11]  }
  0x5b   :  { %v2463_v5 = vpack.c.bf16 %v110_v4, %v109_v2  ;;  %v112_v7 = vld [vmem:[#allocation8 + $0x28] sm:$0xff]  ;;  %v88_v9 = vld [vmem:[#allocation2] sm:$0xff]  ;;  %v113_v10 = vld [vmem:[#allocation8 + $0x30] sm:$0xff]  ;;  %v3015_v59 = vshrl.u32 %v123_v58, 7  ;;  %s1919_s30 = sshll.u32 %s2902_s4, 4  ;;  %s1920_s30 = int_to_ptr.vmem [resolvable:$true] %s1919_s30 }
  0x5c   :  { %2460 = vmatprep.subr.bf16.mxu0 %v2459_v3  ;;  %v2467_v8 = vpack.c.bf16 %v112_v7, %v111_v6  ;;  %v114_v11 = vld [vmem:[#allocation8 + $0x38] sm:$0xff]  ;;  %2146 = vmatprep.mubr.f32.mxu0 %v88_v9  ;;  %v115_v13 = vld [vmem:[#allocation8 + $0x40] sm:$0xff]  ;;  %v116_v14 = vld [vmem:[#allocation8 + $0x48] sm:$0xff]  ;;  %s2862_s6 = scalar_lea.vmem %s1920_s30, 128  ;;  %p2867_p13 = scmp.lt.s32.totalorder %s1920_s30, %s1920_s30 }
  0x5d   :  { %2462 = vmatpush3.bf16.msra.mxu0 %v2459_v3  ;;  %v2471_v12 = vpack.c.bf16 %v114_v11, %v113_v10  ;;  %v2475_v15 = vpack.c.bf16 %v116_v14, %v115_v13  ;;  %v117_v16 = vld [vmem:[#allocation8 + $0x50] sm:$0xff]  ;;  %v118_v17 = vld [vmem:[#allocation8 + $0x58] sm:$0xff]  ;;  %v119_v19 = vld [vmem:[#allocation8 + $0x60] sm:$0xff]  ;;  %v3018_v60 = vsub.s32 0, %v3015_v59  ;;  %p2863_p12 = scmp.ne.s32.totalorder %s1920_s30, %s2862_s6  ;;  %p2868_p0 = scmp.lt.s32.totalorder %s2862_s6, %s2862_s6 }
  0x5e   :  { %2464 = vmatprep.subr.bf16.mxu0 %v2463_v5  ;;  %v2479_v18 = vpack.c.bf16 %v118_v17, %v117_v16  ;;  %v120_v20 = vld [vmem:[#allocation8 + $0x68] sm:$0xff]  ;;  %v121_v22 = vld [vmem:[#allocation8 + $0x70] sm:$0xff]  ;;  %v122_v23 = vld [vmem:[#allocation8 + $0x78] sm:$0xff] }
  0x5f   :  { %v2483_v21 = vpack.c.bf16 %v120_v20, %v119_v19  ;;  %v2487_v24 = vpack.c.bf16 %v122_v23, %v121_v22  ;;  %v89_v25 = vld [vmem:[#allocation2 + $0x8] sm:$0xff]  ;;  %v90_v26 = vld [vmem:[#allocation2 + $0x10] sm:$0xff]  ;;  %v91_v27 = vld [vmem:[#allocation2 + $0x18] sm:$0xff]  ;;  %p2869_p1 = por %p2868_p0, %p2867_p13 }
  0x60   :  { %v92_v28 = vld [vmem:[#allocation2 + $0x20] sm:$0xff]  ;;  %v93_v29 = vld [vmem:[#allocation2 + $0x28] sm:$0xff]  ;;  %v94_v30 = vld [vmem:[#allocation2 + $0x30] sm:$0xff] }
  0x61   :  { %2466 = vmatpush3.bf16.msra.mxu0 %v2463_v5  ;;  %v95_v31 = vld [vmem:[#allocation2 + $0x38] sm:$0xff]  ;;  %v289_v32 = vld [vmem:[#allocation8 + $0x80] sm:$0xff]  ;;  %v290_v33 = vld [vmem:[#allocation8 + $0x88] sm:$0xff]  ;;  %p2870_p2 = pnand %p2869_p1, %p2863_p12 }
  0x62   :  { %2468 = vmatprep.subr.bf16.mxu0 %v2467_v8  ;;  %v309_v34 = vpack.c.bf16 %v290_v33, %v289_v32  ;;  %v291_v35 = vld [vmem:[#allocation8 + $0x90] sm:$0xff]  ;;  %v292_v36 = vld [vmem:[#allocation8 + $0x98] sm:$0xff]  ;;  %v293_v38 = vld [vmem:[#allocation8 + $0xa0] sm:$0xff] }
  0x63   :  { %v310_v37 = vpack.c.bf16 %v292_v36, %v291_v35  ;;  %v294_v39 = vld [vmem:[#allocation8 + $0xa8] sm:$0xff]  ;;  %v295_v41 = vld [vmem:[#allocation8 + $0xb0] sm:$0xff]  ;;  %v296_v42 = vld [vmem:[#allocation8 + $0xb8] sm:$0xff] }
  0x64   :  { %2158 = vmatprep.subr.bf16.mxu1 %v309_v34  ;;  %v311_v40 = vpack.c.bf16 %v294_v39, %v293_v38  ;;  %v312_v43 = vpack.c.bf16 %v296_v42, %v295_v41  ;;  %v297_v44 = vld [vmem:[#allocation8 + $0xc0] sm:$0xff]  ;;  %v298_v45 = vld [vmem:[#allocation8 + $0xc8] sm:$0xff]  ;;  %v299_v47 = vld [vmem:[#allocation8 + $0xd0] sm:$0xff]  ;;  %v384_v42 = vsub.s32 4, %v3015_v59 }
  0x65   :  { %2470 = vmatpush3.bf16.msra.mxu0 %v2467_v8  ;;  %2159 = vmatpush3.bf16.msra.mxu1 %v309_v34  ;;  %v313_v46 = vpack.c.bf16 %v298_v45, %v297_v44  ;;  %v300_v48 = vld [vmem:[#allocation8 + $0xd8] sm:$0xff]  ;;  %v301_v50 = vld [vmem:[#allocation8 + $0xe0] sm:$0xff]  ;;  %v302_v51 = vld [vmem:[#allocation8 + $0xe8] sm:$0xff] }
  0x66   :  { %2472 = vmatprep.subr.bf16.mxu0 %v2471_v12  ;;  %2160 = vmatprep.subr.bf16.mxu1 %v310_v37  ;;  %v314_v49 = vpack.c.bf16 %v300_v48, %v299_v47  ;;  %v315_v52 = vpack.c.bf16 %v302_v51, %v301_v50  ;;  %v303_v53 = vld [vmem:[#allocation8 + $0xf0] sm:$0xff]  ;;  %v304_v54 = vld [vmem:[#allocation8 + $0xf8] sm:$0xff]  ;;  %v3020_v61 = vld [vmem:[#allocation10] sm:$0xff] }
  0x67   :  { %v316_v55 = vpack.c.bf16 %v304_v54, %v303_v53  ;;  %v126_v62 = vrot.slane %v3020_v61, %v3018_v60  ;;  %v385_v47 = vrot.slane %v3020_v61, %v384_v42 }
  0x69   :  { %2474 = vmatpush3.bf16.msra.mxu0 %v2471_v12  ;;  %2161 = vmatpush3.bf16.msra.mxu1 %v310_v37 }
  0x6a   :  { %2476 = vmatprep.subr.bf16.mxu0 %v2475_v15  ;;  %2162 = vmatprep.subr.bf16.mxu1 %v311_v40 }
  0x6d   :  { %2478 = vmatpush3.bf16.msra.mxu0 %v2475_v15  ;;  %2163 = vmatpush3.bf16.msra.mxu1 %v311_v40 }
  0x6e   :  { %2480 = vmatprep.subr.bf16.mxu0 %v2479_v18  ;;  %2164 = vmatprep.subr.bf16.mxu1 %v312_v43 }
  0x71   :  { %2482 = vmatpush3.bf16.msra.mxu0 %v2479_v18  ;;  %2165 = vmatpush3.bf16.msra.mxu1 %v312_v43 }
  0x72   :  { %2484 = vmatprep.subr.bf16.mxu0 %v2483_v21  ;;  %2166 = vmatprep.subr.bf16.mxu1 %v313_v46 }
  0x75   :  { %2486 = vmatpush3.bf16.msra.mxu0 %v2483_v21  ;;  %2167 = vmatpush3.bf16.msra.mxu1 %v313_v46 }
  0x76   :  { %2488 = vmatprep.subr.bf16.mxu0 %v2487_v24  ;;  %2168 = vmatprep.subr.bf16.mxu1 %v314_v49 }
  0x79   :  { %2490 = vmatpush3.bf16.msra.mxu0 %v2487_v24  ;;  %2169 = vmatpush3.bf16.msra.mxu1 %v314_v49 }
  0x7a   :  { %2170 = vmatprep.subr.bf16.mxu1 %v315_v52  ;;  %2491 = vmatprep.subr.bf16.mxu0 %v2899_v56 }
  0x7c   :  { %2147 = vmatmul.mubr.f32.vlgmr.msra.gmra.mrb[0].mxu0 %v89_v25 }
  0x7d   :  { %2149 = vmatprep.mubr.f32.mxu0 %v90_v26  ;;  %2171 = vmatpush3.bf16.msra.mxu1 %v315_v52 }
  0x7e   :  { %2172 = vmatprep.subr.bf16.mxu1 %v316_v55 }
  0x80   :  { %2150 = vmatmul.mubr.f32.gmra.mrb[2].mxu0 %v91_v27 }
  0x81   :  { %2152 = vmatprep.mubr.f32.mxu0 %v92_v28  ;;  %2173 = vmatpush3.bf16.msra.mxu1 %v316_v55 }
  0x84   :  { %2153 = vmatmul.mubr.f32.gmra.mrb[4].mxu0 %v93_v29 }
  0x85   :  { %2155 = vmatprep.mubr.f32.mxu0 %v94_v30 }
  0x88   :  { %2156 = vmatmul.mubr.f32.gmra.mrb[6].mxu0 %v95_v31 }
  0x89   :  { %2198 = vmatprep.mubr.msk.f32.mxu0 %vm2900_vm0, %v2901_v57 }
 0x14f   :  { %v2148_v63 = vpop.f32.mrb[0].mxu0 }
 0x150   :  { %v3024_v0 = vadd.f32 %v2148_v63, %v126_v62  ;;  %v193_v1 = vpop.f32.mrb[1].mxu0 }
 0x151   :  { %v3026_v2 = vadd.f32 %v193_v1, %v126_v62 }
 0x152   :  { %v233_v3 = vsub.f32 0.0, %v3024_v0 }
 0x153   :  { %v232_v4 = vsub.f32 0.0, %v3026_v2  ;;  %v2151_v5 = vpop.f32.mrb[2].mxu0 }
 0x154   :  { %v242_v6 = vmul.f32 1.442695, %v233_v3  ;;  %v3030_v7 = vadd.f32 %v2151_v5, %v126_v62  ;;  %v203_v8 = vpop.f32.mrb[3].mxu0 }
 0x155   :  { %v240_v9 = vmul.f32 1.442695, %v232_v4  ;;  %v3032_v10 = vadd.f32 %v203_v8, %v126_v62 }
 0x156   :  { %2622 = vpow2.f32 %v242_v6  ;;  %v235_v11 = vsub.f32 0.0, %v3030_v7 }
 0x157   :  { %2624 = vpow2.f32 %v240_v9  ;;  %v234_v12 = vsub.f32 0.0, %v3032_v10  ;;  %v2154_v13 = vpop.f32.mrb[4].mxu0 }
 0x158   :  { %v246_v14 = vmul.f32 1.442695, %v235_v11  ;;  %v3036_v15 = vadd.f32 %v2154_v13, %v126_v62  ;;  %v213_v16 = vpop.f32.mrb[5].mxu0 }
 0x159   :  { %v244_v17 = vmul.f32 1.442695, %v234_v12  ;;  %v3038_v18 = vadd.f32 %v213_v16, %v126_v62 }
 0x15a   :  { %2626 = vpow2.f32 %v246_v14  ;;  %v237_v19 = vsub.f32 0.0, %v3036_v15 }
 0x15b   :  { %2628 = vpow2.f32 %v244_v17  ;;  %v236_v20 = vsub.f32 0.0, %v3038_v18  ;;  %v2157_v21 = vpop.f32.mrb[6].mxu0 }
 0x15c   :  { %v250_v22 = vmul.f32 1.442695, %v237_v19  ;;  %v3042_v23 = vadd.f32 %v2157_v21, %v126_v62  ;;  %v223_v24 = vpop.f32.mrb[7].mxu0 }
 0x15d   :  { %v248_v25 = vmul.f32 1.442695, %v236_v20  ;;  %v3044_v26 = vadd.f32 %v223_v24, %v126_v62 }
 0x15e   :  { %2630 = vpow2.f32 %v250_v22  ;;  %v239_v27 = vsub.f32 0.0, %v3042_v23 }
 0x15f   :  { %2632 = vpow2.f32 %v248_v25  ;;  %v238_v28 = vsub.f32 0.0, %v3044_v26 }
 0x160   :  { %v2623_v29 = vpop.eup %2622  ;;  %v254_v30 = vmul.f32 1.442695, %v239_v27 }
 0x161   :  { %v2625_v31 = vpop.eup %2624  ;;  %v257_v32 = vadd.f32 1.0, %v2623_v29  ;;  %v252_v33 = vmul.f32 1.442695, %v238_v28 }
 0x162   :  { %v256_v34 = vadd.f32 1.0, %v2625_v31  ;;  %2634 = vpow2.f32 %v254_v30 }
 0x163   :  { %2636 = vrcp.f32 %v257_v32 }
 0x164   :  { %v2627_v35 = vpop.eup %2626  ;;  %2638 = vrcp.f32 %v256_v34 }
 0x165   :  { %v2629_v36 = vpop.eup %2628  ;;  %v259_v37 = vadd.f32 1.0, %v2627_v35  ;;  %2640 = vpow2.f32 %v252_v33 }
 0x166   :  { %v258_v38 = vadd.f32 1.0, %v2629_v36 }
 0x167   :  { %2642 = vrcp.f32 %v259_v37  ;;  %v3067_v37 = vld [vmem:[#allocation5 + $0x8] sm:$0xff] }
 0x168   :  { %v2631_v39 = vpop.eup %2630  ;;  %2644 = vrcp.f32 %v258_v38  ;;  %v3069_v38 = vld [vmem:[#allocation5] sm:$0xff]  ;;  %vm520_vm1 = vcmp.gt.f32.partialorder %v3067_v37, 0.0 }
 0x169   :  { %v2633_v40 = vpop.eup %2632  ;;  %v261_v41 = vadd.f32 1.0, %v2631_v39  ;;  %v3071_v39 = vld [vmem:[#allocation5 + $0x18] sm:$0xff]  ;;  %vm519_vm3 = vcmp.gt.f32.partialorder %v3069_v38, 0.0 }
 0x16a   :  { %v260_v43 = vadd.f32 1.0, %v2633_v40  ;;  %v3073_v40 = vld [vmem:[#allocation5 + $0x10] sm:$0xff]  ;;  %vm522_vm4 = vcmp.gt.f32.partialorder %v3071_v39, 0.0 }
 0x16b   :  { %2646 = vrcp.f32 %v261_v41  ;;  %vm521_vm5 = vcmp.gt.f32.partialorder %v3073_v40, 0.0 }
 0x16c   :  { %v2635_v44 = vpop.eup %2634  ;;  %2648 = vrcp.f32 %v260_v43 }
 0x16d   :  { %v2637_v45 = vpop.eup %2636  ;;  %v263_v46 = vadd.f32 1.0, %v2635_v44 }
 0x16e   :  { %v2639_v48 = vpop.eup %2638  ;;  %v281_v49 = vmul.f32 %v2637_v45, %v3024_v0 }
 0x16f   :  { %v2641_v50 = vpop.eup %2640  ;;  %2650 = vrcp.f32 %v263_v46  ;;  %v280_v51 = vmul.f32 %v2639_v48, %v3026_v2 }
 0x170   :  { %v262_v52 = vadd.f32 1.0, %v2641_v50  ;;  %v387_v0 = vmul.f32 %v385_v47, %v281_v49 }
 0x171   :  { %v2643_v53 = vpop.eup %2642  ;;  %v386_v54 = vmul.f32 %v385_v47, %v280_v51  ;;  %v305_v55 = vpack.c.bf16 %v281_v49, %v280_v51 }
 0x172   :  { %v2645_v58 = vpop.eup %2644  ;;  %v283_v62 = vmul.f32 %v2643_v53, %v3030_v7  ;;  %2652 = vrcp.f32 %v262_v52 }
 0x173   :  { %394 = vadd.xlane.f32.xlu0 %v386_v54  ;;  %2174 = vmatprep.mubr.bf16.mxu1 %v305_v55  ;;  %v282_v63 = vmul.f32 %v2645_v58, %v3032_v10 }
 0x174   :  { %2493 = vmatpush3.bf16.xpose.msra.mxu0 %v305_v55  ;;  %v389_v8 = vmul.f32 %v385_v47, %v283_v62 }
 0x175   :  { %v2647_v1 = vpop.eup %2646  ;;  %v388_v3 = vmul.f32 %v385_v47, %v282_v63  ;;  %v306_v4 = vpack.c.bf16 %v283_v62, %v282_v63  ;;  %2494 = vmatprep.subr.bf16.mxu0 %v2899_v56 }
 0x176   :  { %v2649_v2 = vpop.eup %2648  ;;  %v285_v5 = vmul.f32 %v2647_v1, %v3036_v15 }
 0x177   :  { %v284_v6 = vmul.f32 %v2649_v2, %v3038_v18  ;;  %398 = vadd.xlane.f32.xlu1 %v388_v3  ;;  %396 = vadd.xlane.f32.xlu0 %v387_v0  ;;  %v411_v18 = vrot.slane %v3020_v61, 7 }
 0x178   :  { %2175 = vmatmul.mubr.bf16.vlgmr.msra.gmra.mrb[0].mxu1 %v306_v4  ;;  %v391_v14 = vmul.f32 %v385_v47, %v285_v5 }
 0x179   :  { %v2651_v7 = vpop.eup %2650  ;;  %v390_v9 = vmul.f32 %v385_v47, %v284_v6  ;;  %v307_v11 = vpack.c.bf16 %v285_v5, %v284_v6 }
 0x17a   :  { %v287_v10 = vmul.f32 %v2651_v7, %v3042_v23  ;;  %v3084_v7 = vld [vmem:[#allocation5 + $0x28] sm:$0xff] }
 0x17b   :  { %400 = vadd.xlane.f32.xlu1 %v389_v8  ;;  %402 = vadd.xlane.f32.xlu0 %v390_v9  ;;  %v3086_v8 = vld [vmem:[#allocation5 + $0x20] sm:$0xff]  ;;  %vm524_vm12 = vcmp.gt.f32.partialorder %v3084_v7, 0.0 }
 0x17c   :  { %v2653_v12 = vpop.eup %2652  ;;  %2178 = vmatprep.mubr.bf16.mxu1 %v307_v11  ;;  %2496 = vmatpush3.bf16.xpose.msra.mxu0 %v306_v4  ;;  %v393_v17 = vmul.f32 %v385_v47, %v287_v10  ;;  %vm523_vm13 = vcmp.gt.f32.partialorder %v3086_v8, 0.0 }
 0x17d   :  { %v286_v13 = vmul.f32 %v2653_v12, %v3044_v26  ;;  %2497 = vmatprep.subr.bf16.mxu0 %v2899_v56 }
 0x17f   :  { %404 = vadd.xlane.f32.xlu1 %v391_v14  ;;  %v392_v15 = vmul.f32 %v385_v47, %v286_v13  ;;  %v308_v16 = vpack.c.bf16 %v287_v10, %v286_v13 }
 0x181   :  { %406 = vadd.xlane.f32.xlu0 %v392_v15  ;;  %2179 = vmatmul.mubr.bf16.gmra.mrb[4].mxu1 %v308_v16  ;;  %v3096_v15 = vld [vmem:[#allocation5 + $0x38] sm:$0xff] }
 0x183   :  { %408 = vadd.xlane.f32.xlu1 %v393_v17 }
 0x184   :  { %2499 = vmatpush3.bf16.xpose.msra.mxu0 %v307_v11 }
 0x185   :  { %2500 = vmatprep.subr.bf16.mxu0 %v2899_v56 }
 0x18c   :  { %2502 = vmatpush3.bf16.xpose.msra.mxu0 %v308_v16  ;;  %v3098_v16 = vld [vmem:[#allocation5 + $0x30] sm:$0xff] }
 0x18d   :  { %2503 = vmatprep.subr.bf16.mxu0 %v2899_v56 }
 0x193   :  { %2199 = vmatmul.mubr.f32.vlgmr.msra.gmra.mrb[8].mxu0 %v411_v18 }
 0x194   :  { %2257 = vmatprep.mubr.msk.f32.mxu0 %vm2900_vm0, %v2901_v57 }
 0x200   :  { %v395_v27 = vpop.xlane.xlu0 %394 }
 0x204   :  { %v399_v29 = vpop.xlane.xlu1 %398  ;;  %v397_v33 = vpop.xlane.xlu0 %396 }
 0x208   :  { %v401_v34 = vpop.xlane.xlu1 %400  ;;  %v403_v35 = vpop.xlane.xlu0 %402 }
 0x20c   :  { %v405_v36 = vpop.xlane.xlu1 %404 }
 0x20e   :  { %v407_v45 = vpop.xlane.xlu0 %406 }
 0x210   :  { %v409_v46 = vpop.xlane.xlu1 %408 }
 0x24b   :  { %v2176_v19 = vpop.f32.mrb[0].mxu1 }
 0x24c   :  { %v351_v20 = vpop.f32.mrb[1].mxu1 }
 0x24d   :  { %v2177_v21 = vpop.f32.mrb[2].mxu1 }
 0x24e   :  { %v629_v22 = vpack.c.bf16 %v2177_v21, %v2176_v19  ;;  %v354_v23 = vpop.f32.mrb[3].mxu1 }
 0x24f   :  { %v628_v24 = vpack.c.bf16 %v354_v23, %v351_v20 }
 0x251   :  { %2201 = vmatprep.subr.bf16.mxu1 %v628_v24 }
 0x252   :  { %2202 = vmatpush3.bf16.msra.mxu1 %v628_v24 }
 0x253   :  { %2203 = vmatprep.subr.bf16.mxu1 %v629_v22 }
 0x254   :  { %v2180_v25 = vpop.f32.mrb[4].mxu1 }
 0x255   :  { %v367_v26 = vpop.f32.mrb[5].mxu1 }
 0x256   :  { %v2181_v28 = vpop.f32.mrb[6].mxu1  ;;  %2204 = vmatpush3.bf16.msra.mxu1 %v629_v22 }
 0x257   :  { %v631_v30 = vpack.c.bf16 %v2181_v28, %v2180_v25  ;;  %v370_v31 = vpop.f32.mrb[7].mxu1 }
 0x258   :  { %v630_v32 = vpack.c.bf16 %v370_v31, %v367_v26 }
 0x25a   :  { %2205 = vmatprep.subr.bf16.mxu1 %v630_v32 }
 0x25b   :  { %2206 = vmatpush3.bf16.msra.mxu1 %v630_v32 }
 0x25c   :  { %2207 = vmatprep.subr.bf16.mxu1 %v631_v30 }
 0x25f   :  { %2208 = vmatpush3.bf16.msra.mxu1 %v631_v30 }
 0x266   :  { %v479_v41 = vpop.f32.mrb[8].mxu0 }
 0x267   :  { %v486_v43 = vrot.slane %v479_v41, %v3018_v60  ;;  %v2200_v44 = vpop.f32.mrb[9].mxu0 }
 0x269   :  { %v488_v47 = vadd.f32 %v486_v43, %v397_v33  ;;  %v487_v48 = vadd.f32 %v486_v43, %v395_v27  ;;  %v490_v49 = vadd.f32 %v486_v43, %v401_v34  ;;  %v489_v50 = vadd.f32 %v486_v43, %v399_v29 }
 0x26a   :  { %v492_v51 = vadd.f32 %v486_v43, %v405_v36  ;;  %v491_v52 = vadd.f32 %v486_v43, %v403_v35  ;;  %v494_v53 = vadd.f32 %v486_v43, %v409_v46  ;;  %v493_v54 = vadd.f32 %v486_v43, %v407_v45 }
 0x26b   :  { %vm496_vm6 = vcmp.ge.f32.partialorder %v488_v47, 0.0  ;;  %v504_v55 = vmul.f32 0.2, %v488_v47  ;;  %vm495_vm7 = vcmp.ge.f32.partialorder %v487_v48, 0.0  ;;  %v503_v58 = vmul.f32 0.2, %v487_v48 }
 0x26c   :  { %vm498_vm8 = vcmp.ge.f32.partialorder %v490_v49, 0.0  ;;  %v506_v62 = vmul.f32 0.2, %v490_v49  ;;  %vm497_vm9 = vcmp.ge.f32.partialorder %v489_v50, 0.0  ;;  %v505_v63 = vmul.f32 0.2, %v489_v50 }
 0x26d   :  { %v512_v1 = vsel %vm496_vm6, %v488_v47, %v504_v55  ;;  %v511_v3 = vsel %vm495_vm7, %v487_v48, %v503_v58  ;;  %vm500_vm10 = vcmp.ge.f32.partialorder %v492_v51, 0.0  ;;  %v508_v0 = vmul.f32 0.2, %v492_v51 }
 0x26e   :  { %v528_v4 = vsel %vm520_vm1, %v512_v1, -1e+30  ;;  %v527_v2 = vsel %vm519_vm3, %v511_v3, -1e+30  ;;  %v514_v5 = vsel %vm498_vm8, %v490_v49, %v506_v62  ;;  %v513_v6 = vsel %vm497_vm9, %v489_v50, %v505_v63 }
 0x26f   :  { %v539_v9 = vsel %vm535_vm2, %v528_v4, -inf  ;;  %v536_v11 = vsel %vm535_vm2, %v527_v2, -inf  ;;  %v530_v10 = vsel %vm522_vm4, %v514_v5, -1e+30  ;;  %v529_v12 = vsel %vm521_vm5, %v513_v6, -1e+30 }
 0x270   :  { %540 = vmax.xlane.f32.xlu1 %v539_v9  ;;  %537 = vmax.xlane.f32.xlu0 %v536_v11  ;;  %vm499_vm11 = vcmp.ge.f32.partialorder %v491_v52, 0.0  ;;  %v516_v13 = vsel %vm500_vm10, %v492_v51, %v508_v0  ;;  %v507_v14 = vmul.f32 0.2, %v491_v52  ;;  %vm502_vm14 = vcmp.ge.f32.partialorder %v494_v53, 0.0 }
 0x271   :  { %v510_v17 = vmul.f32 0.2, %v494_v53  ;;  %vm501_vm15 = vcmp.ge.f32.partialorder %v493_v54, 0.0  ;;  %v509_v18 = vmul.f32 0.2, %v493_v54  ;;  %v545_v19 = vsel %vm535_vm2, %v530_v10, -inf }
 0x272   :  { %v542_v20 = vsel %vm535_vm2, %v529_v12, -inf  ;;  %v515_v21 = vsel %vm499_vm11, %v491_v52, %v507_v14  ;;  %v532_v22 = vsel %vm524_vm12, %v516_v13, -1e+30  ;;  %vm526_vm6 = vcmp.gt.f32.partialorder %v3096_v15, 0.0 }
 0x273   :  { %v531_v23 = vsel %vm523_vm13, %v515_v21, -1e+30  ;;  %v518_v24 = vsel %vm502_vm14, %v494_v53, %v510_v17  ;;  %v517_v25 = vsel %vm501_vm15, %v493_v54, %v509_v18  ;;  %vm525_vm7 = vcmp.gt.f32.partialorder %v3098_v16, 0.0 }
 0x274   :  { %546 = vmax.xlane.f32.xlu1 %v545_v19  ;;  %543 = vmax.xlane.f32.xlu0 %v542_v20  ;;  %v551_v26 = vsel %vm535_vm2, %v532_v22, -inf  ;;  %v548_v27 = vsel %vm535_vm2, %v531_v23, -inf  ;;  %v534_v28 = vsel %vm526_vm6, %v518_v24, -1e+30  ;;  %v533_v29 = vsel %vm525_vm7, %v517_v25, -1e+30 }
 0x275   :  { %v557_v30 = vsel %vm535_vm2, %v534_v28, -inf  ;;  %v554_v31 = vsel %vm535_vm2, %v533_v29, -inf }
 0x278   :  { %552 = vmax.xlane.f32.xlu1 %v551_v26  ;;  %549 = vmax.xlane.f32.xlu0 %v548_v27 }
 0x27c   :  { %558 = vmax.xlane.f32.xlu1 %v557_v30  ;;  %555 = vmax.xlane.f32.xlu0 %v554_v31 }
 0x2fd   :  { %v541_v32 = vpop.xlane.xlu1 %540  ;;  %v538_v33 = vpop.xlane.xlu0 %537 }
 0x2fe   :  { %v561_v34 = vsub.f32 %v528_v4, %v541_v32  ;;  %v560_v35 = vsub.f32 %v527_v2, %v538_v33 }
 0x300   :  { %v570_v36 = vmul.f32 1.442695, %v561_v34  ;;  %v568_v41 = vmul.f32 1.442695, %v560_v35 }
 0x301   :  { %v547_v43 = vpop.xlane.xlu1 %546  ;;  %v544_v44 = vpop.xlane.xlu0 %543 }
 0x302   :  { %2654 = vpow2.f32 %v570_v36  ;;  %v563_v45 = vsub.f32 %v530_v10, %v547_v43  ;;  %v562_v46 = vsub.f32 %v529_v12, %v544_v44 }
 0x303   :  { %2656 = vpow2.f32 %v568_v41 }
 0x304   :  { %v574_v47 = vmul.f32 1.442695, %v563_v45  ;;  %v572_v48 = vmul.f32 1.442695, %v562_v46  ;;  %v724_v46 = vld [vmem:[#allocation8 + $0x110] sm:$0xff] }
 0x305   :  { %v553_v49 = vpop.xlane.xlu1 %552  ;;  %v550_v50 = vpop.xlane.xlu0 %549 }
 0x306   :  { %2658 = vpow2.f32 %v574_v47  ;;  %v565_v51 = vsub.f32 %v532_v22, %v553_v49  ;;  %v564_v52 = vsub.f32 %v531_v23, %v550_v50  ;;  %v722_v22 = vld [vmem:[#allocation8 + $0x100] sm:$0xff]  ;;  %v723_v23 = vld [vmem:[#allocation8 + $0x108] sm:$0xff]  ;;  %v725_v47 = vld [vmem:[#allocation8 + $0x118] sm:$0xff] }
 0x307   :  { %2660 = vpow2.f32 %v572_v48  ;;  %v742_v24 = vpack.c.bf16 %v723_v23, %v722_v22  ;;  %v737_v22 = vld [vmem:[#allocation8 + $0x178] sm:$0xff] }
 0x308   :  { %v578_v53 = vmul.f32 1.442695, %v565_v51  ;;  %v576_v54 = vmul.f32 1.442695, %v564_v52  ;;  %v743_v51 = vpack.c.bf16 %v725_v47, %v724_v46 }
 0x309   :  { %v559_v55 = vpop.xlane.xlu1 %558  ;;  %v556_v58 = vpop.xlane.xlu0 %555  ;;  %2217 = vmatprep.subr.bf16.mxu1 %v742_v24 }
 0x30a   :  { %2662 = vpow2.f32 %v578_v53  ;;  %v567_v62 = vsub.f32 %v534_v28, %v559_v55  ;;  %v566_v63 = vsub.f32 %v533_v29, %v556_v58  ;;  %v727_v55 = vld [vmem:[#allocation8 + $0x128] sm:$0xff] }
 0x30b   :  { %2664 = vpow2.f32 %v576_v54  ;;  %v726_v54 = vld [vmem:[#allocation8 + $0x120] sm:$0xff] }
 0x30c   :  { %v2655_v1 = vpop.eup %2654  ;;  %v582_v3 = vmul.f32 1.442695, %v567_v62  ;;  %v580_v0 = vmul.f32 1.442695, %v566_v63 }
 0x30d   :  { %v2657_v4 = vpop.eup %2656  ;;  %v587_v2 = vsel %vm535_vm2, %v2655_v1, 0.0 }
 0x30e   :  { %2666 = vpow2.f32 %v582_v3  ;;  %588 = vadd.xlane.f32.xlu1 %v587_v2  ;;  %v584_v5 = vsel %vm535_vm2, %v2657_v4, 0.0  ;;  %v729_v2 = vld [vmem:[#allocation8 + $0x138] sm:$0xff] }
 0x30f   :  { %2668 = vpow2.f32 %v580_v0  ;;  %585 = vadd.xlane.f32.xlu0 %v584_v5 }
 0x310   :  { %v2659_v6 = vpop.eup %2658 }
 0x311   :  { %v2661_v9 = vpop.eup %2660  ;;  %v593_v11 = vsel %vm535_vm2, %v2659_v6, 0.0 }
 0x312   :  { %594 = vadd.xlane.f32.xlu1 %v593_v11  ;;  %v590_v10 = vsel %vm535_vm2, %v2661_v9, 0.0  ;;  %v730_v11 = vld [vmem:[#allocation8 + $0x140] sm:$0xff] }
 0x313   :  { %591 = vadd.xlane.f32.xlu0 %v590_v10  ;;  %v731_v10 = vld [vmem:[#allocation8 + $0x148] sm:$0xff] }
 0x314   :  { %v2663_v12 = vpop.eup %2662 }
 0x315   :  { %v2665_v13 = vpop.eup %2664  ;;  %v599_v14 = vsel %vm535_vm2, %v2663_v12, 0.0 }
 0x316   :  { %600 = vadd.xlane.f32.xlu1 %v599_v14  ;;  %v596_v17 = vsel %vm535_vm2, %v2665_v13, 0.0  ;;  %v733_v14 = vld [vmem:[#allocation8 + $0x158] sm:$0xff] }
 0x317   :  { %597 = vadd.xlane.f32.xlu0 %v596_v17 }
 0x318   :  { %v2667_v18 = vpop.eup %2666 }
 0x319   :  { %v2669_v19 = vpop.eup %2668  ;;  %v605_v20 = vsel %vm535_vm2, %v2667_v18, 0.0 }
 0x31a   :  { %606 = vadd.xlane.f32.xlu1 %v605_v20  ;;  %v602_v21 = vsel %vm535_vm2, %v2669_v19, 0.0 }
 0x31b   :  { %603 = vadd.xlane.f32.xlu0 %v602_v21  ;;  %v736_v21 = vld [vmem:[#allocation8 + $0x170] sm:$0xff] }
 0x31c   :  { %v749_v23 = vpack.c.bf16 %v737_v22, %v736_v21 }
 0x39b   :  { %v589_v25 = vpop.xlane.xlu1 %588 }
 0x39c   :  { %2670 = vrcp.f32 %v589_v25  ;;  %v586_v26 = vpop.xlane.xlu0 %585 }
 0x39d   :  { %2672 = vrcp.f32 %v586_v26  ;;  %v817_v26 = vsub.s32 5, %v3015_v59 }
 0x39f   :  { %v595_v27 = vpop.xlane.xlu1 %594 }
 0x3a0   :  { %2674 = vrcp.f32 %v595_v27  ;;  %v592_v28 = vpop.xlane.xlu0 %591 }
 0x3a1   :  { %2676 = vrcp.f32 %v592_v28 }
 0x3a3   :  { %v601_v29 = vpop.xlane.xlu1 %600 }
 0x3a4   :  { %2678 = vrcp.f32 %v601_v29  ;;  %v598_v30 = vpop.xlane.xlu0 %597 }
 0x3a5   :  { %2680 = vrcp.f32 %v598_v30 }
 0x3a6   :  { %v2671_v31 = vpop.eup %2670 }
 0x3a7   :  { %v2673_v32 = vpop.eup %2672  ;;  %v607_v33 = vpop.xlane.xlu1 %606  ;;  %v617_v34 = vmul.f32 %v2671_v31, %v2655_v1  ;;  %v744_v1 = vpack.c.bf16 %v727_v55, %v726_v54 }
 0x3a8   :  { %2682 = vrcp.f32 %v607_v33  ;;  %v604_v35 = vpop.xlane.xlu0 %603  ;;  %v616_v36 = vmul.f32 %v2673_v32, %v2657_v4  ;;  %v728_v4 = vld [vmem:[#allocation8 + $0x130] sm:$0xff]  ;;  %v818_v32 = vrot.slane %v3020_v61, %v817_v26 }
 0x3a9   :  { %2684 = vrcp.f32 %v604_v35 }
 0x3aa   :  { %v2675_v41 = vpop.eup %2674  ;;  %v624_v43 = vpack.c.bf16 %v617_v34, %v616_v36 }
 0x3ab   :  { %v2677_v44 = vpop.eup %2676  ;;  %v619_v45 = vmul.f32 %v2675_v41, %v2659_v6 }
 0x3ac   :  { %v618_v48 = vmul.f32 %v2677_v44, %v2661_v9  ;;  %2209 = vmatprep.mubr.msk.bf16.mxu1 %vm535_vm2, %v624_v43  ;;  %v745_v9 = vpack.c.bf16 %v729_v2, %v728_v4 }
 0x3ae   :  { %v2679_v49 = vpop.eup %2678  ;;  %v625_v50 = vpack.c.bf16 %v619_v45, %v618_v48 }
 0x3af   :  { %v2681_v52 = vpop.eup %2680  ;;  %v621_v53 = vmul.f32 %v2679_v49, %v2663_v12  ;;  %v746_v12 = vpack.c.bf16 %v731_v10, %v730_v11  ;;  %v3135_v10 = vld [vmem:[#allocation10 + $0x8] sm:$0xff] }
 0x3b0   :  { %2210 = vmatmul.mubr.msk.bf16.vlgmr.msra.gmra.mrb[8].mxu1 %vm535_vm2, %v625_v50  ;;  %v620_v58 = vmul.f32 %v2681_v52, %v2665_v13  ;;  %v732_v13 = vld [vmem:[#allocation8 + $0x150] sm:$0xff] }
 0x3b1   :  { %2218 = vmatpush3.bf16.msra.mxu1 %v742_v24  ;;  %v747_v17 = vpack.c.bf16 %v733_v14, %v732_v13  ;;  %v634_v24 = vsub.s32 1, %v3015_v59 }
 0x3b2   :  { %v2683_v62 = vpop.eup %2682  ;;  %v626_v63 = vpack.c.bf16 %v621_v53, %v620_v58  ;;  %2219 = vmatprep.subr.bf16.mxu1 %v743_v51 }
 0x3b3   :  { %v2685_v3 = vpop.eup %2684  ;;  %v623_v0 = vmul.f32 %v2683_v62, %v2667_v18  ;;  %v734_v18 = vld [vmem:[#allocation8 + $0x160] sm:$0xff]  ;;  %v635_v25 = vrot.slane %v3020_v61, %v634_v24 }
 0x3b4   :  { %2213 = vmatprep.mubr.msk.bf16.mxu1 %vm535_vm2, %v626_v63  ;;  %v622_v5 = vmul.f32 %v2685_v3, %v2669_v19  ;;  %v735_v19 = vld [vmem:[#allocation8 + $0x168] sm:$0xff] }
 0x3b5   :  { %2220 = vmatpush3.bf16.msra.mxu1 %v743_v51  ;;  %v748_v20 = vpack.c.bf16 %v735_v19, %v734_v18 }
 0x3b6   :  { %v627_v6 = vpack.c.bf16 %v623_v0, %v622_v5  ;;  %2221 = vmatprep.subr.bf16.mxu1 %v744_v1 }
 0x3b8   :  { %2214 = vmatmul.mubr.msk.bf16.gmra.mrb[12].mxu1 %vm535_vm2, %v627_v6 }
 0x3b9   :  { %2222 = vmatpush3.bf16.msra.mxu1 %v744_v1 }
 0x3ba   :  { %2223 = vmatprep.subr.bf16.mxu1 %v745_v9 }
 0x3bd   :  { %2224 = vmatpush3.bf16.msra.mxu1 %v745_v9 }
 0x3be   :  { %2225 = vmatprep.subr.bf16.mxu1 %v746_v12 }
 0x3c1   :  { %2226 = vmatpush3.bf16.msra.mxu1 %v746_v12 }
 0x3c2   :  { %2227 = vmatprep.subr.bf16.mxu1 %v747_v17 }
 0x3c5   :  { %2228 = vmatpush3.bf16.msra.mxu1 %v747_v17 }
 0x3c6   :  { %2229 = vmatprep.subr.bf16.mxu1 %v748_v20 }
 0x3c9   :  { %2230 = vmatpush3.bf16.msra.mxu1 %v748_v20 }
 0x3ca   :  { %2231 = vmatprep.subr.bf16.mxu1 %v749_v23 }
 0x3cd   :  { %2232 = vmatpush3.bf16.msra.mxu1 %v749_v23 }
 0x483   :  { %v2211_v27 = vpop.f32.mrb[8].mxu1 }
 0x484   :  { %v691_v28 = vadd.f32 %v2211_v27, %v635_v25  ;;  %v682_v29 = vpop.f32.mrb[9].mxu1 }
 0x485   :  { %v683_v30 = vadd.f32 %v682_v29, %v635_v25  ;;  %v2212_v31 = vpop.f32.mrb[10].mxu1 }
 0x486   :  { %v694_v33 = vadd.f32 %v2212_v31, %v635_v25  ;;  %v685_v34 = vpop.f32.mrb[11].mxu1  ;;  %v715_v41 = vmax.f32 %v691_v28, 0.0 }
 0x487   :  { %v713_v35 = vmax.f32 %v683_v30, 0.0  ;;  %v686_v36 = vadd.f32 %v685_v34, %v635_v25 }
 0x488   :  { %v716_v43 = vmax.f32 %v694_v33, 0.0  ;;  %v821_v61 = vmul.f32 %v818_v32, %v715_v41 }
 0x489   :  { %v714_v44 = vmax.f32 %v686_v36, 0.0  ;;  %v819_v45 = vmul.f32 %v818_v32, %v713_v35 }
 0x48a   :  { %v739_v46 = vpack.c.bf16 %v716_v43, %v715_v41  ;;  %v822_v63 = vmul.f32 %v818_v32, %v716_v43 }
 0x48b   :  { %v738_v47 = vpack.c.bf16 %v714_v44, %v713_v35  ;;  %v2215_v48 = vpop.f32.mrb[12].mxu1  ;;  %827 = vadd.xlane.f32.xlu0 %v819_v45  ;;  %v820_v49 = vmul.f32 %v818_v32, %v714_v44 }
 0x48c   :  { %v707_v50 = vadd.f32 %v2215_v48, %v635_v25  ;;  %v698_v51 = vpop.f32.mrb[13].mxu1 }
 0x48d   :  { %v699_v52 = vadd.f32 %v698_v51, %v635_v25  ;;  %v2216_v53 = vpop.f32.mrb[14].mxu1  ;;  %829 = vadd.xlane.f32.xlu1 %v820_v49  ;;  %2233 = vmatprep.mubr.bf16.mxu1 %v738_v47 }
 0x48e   :  { %v710_v54 = vadd.f32 %v2216_v53, %v635_v25  ;;  %2505 = vmatpush3.bf16.xpose.msra.mxu0 %v738_v47  ;;  %v701_v55 = vpop.f32.mrb[15].mxu1  ;;  %2234 = vmatmul.mubr.bf16.vlgmr.msra.gmra.mrb[16].mxu1 %v739_v46  ;;  %v719_v1 = vmax.f32 %v707_v50, 0.0 }
 0x48f   :  { %v717_v58 = vmax.f32 %v699_v52, 0.0  ;;  %v702_v62 = vadd.f32 %v701_v55, %v635_v25  ;;  %831 = vadd.xlane.f32.xlu0 %v821_v61  ;;  %2506 = vmatprep.subr.bf16.mxu0 %v2899_v56 }
 0x490   :  { %v720_v3 = vmax.f32 %v710_v54, 0.0  ;;  %v825_v9 = vmul.f32 %v818_v32, %v719_v1 }
 0x491   :  { %v718_v0 = vmax.f32 %v702_v62, 0.0  ;;  %833 = vadd.xlane.f32.xlu1 %v822_v63  ;;  %v823_v4 = vmul.f32 %v818_v32, %v717_v58 }
 0x492   :  { %v741_v2 = vpack.c.bf16 %v720_v3, %v719_v1  ;;  %v826_v11 = vmul.f32 %v818_v32, %v720_v3 }
 0x493   :  { %v740_v5 = vpack.c.bf16 %v718_v0, %v717_v58  ;;  %835 = vadd.xlane.f32.xlu0 %v823_v4  ;;  %v824_v6 = vmul.f32 %v818_v32, %v718_v0 }
 0x495   :  { %837 = vadd.xlane.f32.xlu1 %v824_v6  ;;  %2237 = vmatprep.mubr.bf16.mxu1 %v740_v5 }
 0x496   :  { %2508 = vmatpush3.bf16.xpose.msra.mxu0 %v739_v46  ;;  %2238 = vmatmul.mubr.bf16.gmra.mrb[20].mxu1 %v741_v2 }
 0x497   :  { %839 = vadd.xlane.f32.xlu0 %v825_v9  ;;  %2509 = vmatprep.subr.bf16.mxu0 %v2899_v56 }
 0x499   :  { %841 = vadd.xlane.f32.xlu1 %v826_v11 }
 0x49e   :  { %2511 = vmatpush3.bf16.xpose.msra.mxu0 %v740_v5 }
 0x49f   :  { %2512 = vmatprep.subr.bf16.mxu0 %v2899_v56 }
 0x4a6   :  { %2514 = vmatpush3.bf16.xpose.msra.mxu0 %v741_v2 }
 0x4ad   :  { %2258 = vmatmul.mubr.f32.vlgmr.msra.gmra.mrb[10].mxu0 %v3135_v10 }
 0x518   :  { %v828_v26 = vpop.xlane.xlu0 %827 }
 0x51a   :  { %v830_v27 = vpop.xlane.xlu1 %829 }
 0x51c   :  { %v832_v28 = vpop.xlane.xlu0 %831 }
 0x51e   :  { %v834_v29 = vpop.xlane.xlu1 %833 }
 0x520   :  { %v836_v30 = vpop.xlane.xlu0 %835 }
 0x522   :  { %v838_v31 = vpop.xlane.xlu1 %837 }
 0x524   :  { %v840_v35 = vpop.xlane.xlu0 %839 }
 0x526   :  { %v842_v36 = vpop.xlane.xlu1 %841 }
 0x561   :  { %v2235_v12 = vpop.f32.mrb[16].mxu1 }
 0x562   :  { %v784_v13 = vpop.f32.mrb[17].mxu1 }
 0x563   :  { %v2236_v14 = vpop.f32.mrb[18].mxu1 }
 0x564   :  { %v1050_v17 = vpack.c.bf16 %v2236_v14, %v2235_v12  ;;  %v787_v18 = vpop.f32.mrb[19].mxu1 }
 0x565   :  { %v1049_v19 = vpack.c.bf16 %v787_v18, %v784_v13 }
 0x567   :  { %2260 = vmatprep.subr.bf16.mxu1 %v1049_v19 }
 0x568   :  { %2261 = vmatpush3.bf16.msra.mxu1 %v1049_v19 }
 0x569   :  { %v2239_v20 = vpop.f32.mrb[20].mxu1  ;;  %2262 = vmatprep.subr.bf16.mxu1 %v1050_v17 }
 0x56a   :  { %v800_v21 = vpop.f32.mrb[21].mxu1 }
 0x56b   :  { %v2240_v22 = vpop.f32.mrb[22].mxu1 }
 0x56c   :  { %v1052_v23 = vpack.c.bf16 %v2240_v22, %v2239_v20  ;;  %v803_v24 = vpop.f32.mrb[23].mxu1  ;;  %2263 = vmatpush3.bf16.msra.mxu1 %v1050_v17 }
 0x56d   :  { %v1051_v25 = vpack.c.bf16 %v803_v24, %v800_v21 }
 0x56f   :  { %2264 = vmatprep.subr.bf16.mxu1 %v1051_v25 }
 0x570   :  { %2265 = vmatpush3.bf16.msra.mxu1 %v1051_v25 }
 0x571   :  { %2266 = vmatprep.subr.bf16.mxu1 %v1052_v23 }
 0x574   :  { %2267 = vmatpush3.bf16.msra.mxu1 %v1052_v23 }
 0x575   :  { %2515 = vmatprep.subr.bf16.mxu1 %v2899_v56 }
 0x580   :  { %v909_v32 = vpop.f32.mrb[10].mxu0 }
 0x581   :  { %v916_v33 = vrot.slane %v909_v32, %v3018_v60  ;;  %v2259_v34 = vpop.f32.mrb[11].mxu0 }
 0x583   :  { %v918_v41 = vadd.f32 %v916_v33, %v830_v27  ;;  %v917_v43 = vadd.f32 %v916_v33, %v828_v26  ;;  %v920_v44 = vadd.f32 %v916_v33, %v834_v29  ;;  %v919_v45 = vadd.f32 %v916_v33, %v832_v28 }
 0x584   :  { %v922_v46 = vadd.f32 %v916_v33, %v838_v31  ;;  %v921_v47 = vadd.f32 %v916_v33, %v836_v30  ;;  %v924_v48 = vadd.f32 %v916_v33, %v842_v36  ;;  %v923_v49 = vadd.f32 %v916_v33, %v840_v35 }
 0x585   :  { %vm926_vm8 = vcmp.ge.f32.partialorder %v918_v41, 0.0  ;;  %v934_v50 = vmul.f32 0.2, %v918_v41  ;;  %vm925_vm9 = vcmp.ge.f32.partialorder %v917_v43, 0.0  ;;  %v933_v51 = vmul.f32 0.2, %v917_v43 }
 0x586   :  { %vm928_vm10 = vcmp.ge.f32.partialorder %v920_v44, 0.0  ;;  %v936_v52 = vmul.f32 0.2, %v920_v44  ;;  %vm927_vm11 = vcmp.ge.f32.partialorder %v919_v45, 0.0  ;;  %v935_v53 = vmul.f32 0.2, %v919_v45 }
 0x587   :  { %v942_v61 = vsel %vm926_vm8, %v918_v41, %v934_v50  ;;  %v941_v54 = vsel %vm925_vm9, %v917_v43, %v933_v51  ;;  %vm930_vm14 = vcmp.ge.f32.partialorder %v922_v46, 0.0  ;;  %v938_v55 = vmul.f32 0.2, %v922_v46 }
 0x588   :  { %v950_v58 = vsel %vm520_vm1, %v942_v61, -1e+30  ;;  %v949_v62 = vsel %vm519_vm3, %v941_v54, -1e+30  ;;  %v944_v63 = vsel %vm928_vm10, %v920_v44, %v936_v52  ;;  %v943_v1 = vsel %vm927_vm11, %v919_v45, %v935_v53 }
 0x589   :  { %v960_v3 = vsel %vm535_vm2, %v950_v58, -inf  ;;  %v957_v0 = vsel %vm535_vm2, %v949_v62, -inf  ;;  %v952_v4 = vsel %vm522_vm4, %v944_v63, -1e+30  ;;  %v951_v2 = vsel %vm521_vm5, %v943_v1, -1e+30 }
 0x58a   :  { %961 = vmax.xlane.f32.xlu1 %v960_v3  ;;  %958 = vmax.xlane.f32.xlu0 %v957_v0  ;;  %vm929_vm15 = vcmp.ge.f32.partialorder %v921_v47, 0.0  ;;  %v946_v5 = vsel %vm930_vm14, %v922_v46, %v938_v55  ;;  %v937_v6 = vmul.f32 0.2, %v921_v47  ;;  %vm932_vm8 = vcmp.ge.f32.partialorder %v924_v48, 0.0 }
 0x58b   :  { %v940_v9 = vmul.f32 0.2, %v924_v48  ;;  %vm931_vm9 = vcmp.ge.f32.partialorder %v923_v49, 0.0  ;;  %v939_v11 = vmul.f32 0.2, %v923_v49  ;;  %v966_v12 = vsel %vm535_vm2, %v952_v4, -inf }
 0x58c   :  { %v963_v13 = vsel %vm535_vm2, %v951_v2, -inf  ;;  %v945_v14 = vsel %vm929_vm15, %v921_v47, %v937_v6  ;;  %v954_v17 = vsel %vm524_vm12, %v946_v5, -1e+30 }
 0x58d   :  { %v953_v18 = vsel %vm523_vm13, %v945_v14, -1e+30  ;;  %v948_v19 = vsel %vm932_vm8, %v924_v48, %v940_v9  ;;  %v947_v20 = vsel %vm931_vm9, %v923_v49, %v939_v11  ;;  %v972_v21 = vsel %vm535_vm2, %v954_v17, -inf }
 0x58e   :  { %967 = vmax.xlane.f32.xlu1 %v966_v12  ;;  %964 = vmax.xlane.f32.xlu0 %v963_v13  ;;  %v969_v22 = vsel %vm535_vm2, %v953_v18, -inf  ;;  %v956_v23 = vsel %vm526_vm6, %v948_v19, -1e+30  ;;  %v955_v24 = vsel %vm525_vm7, %v947_v20, -1e+30  ;;  %v1145_v19 = vld [vmem:[#allocation8 + $0x190] sm:$0xff] }
 0x58f   :  { %v978_v25 = vsel %vm535_vm2, %v956_v23, -inf  ;;  %v975_v26 = vsel %vm535_vm2, %v955_v24, -inf }
 0x592   :  { %973 = vmax.xlane.f32.xlu1 %v972_v21  ;;  %970 = vmax.xlane.f32.xlu0 %v969_v22  ;;  %v1146_v21 = vld [vmem:[#allocation8 + $0x198] sm:$0xff] }
 0x593   :  { %v1164_v22 = vpack.c.bf16 %v1146_v21, %v1145_v19  ;;  %v1157_v19 = vld [vmem:[#allocation8 + $0x1f0] sm:$0xff] }
 0x596   :  { %979 = vmax.xlane.f32.xlu1 %v978_v25  ;;  %976 = vmax.xlane.f32.xlu0 %v975_v26  ;;  %v1149_v26 = vld [vmem:[#allocation8 + $0x1b0] sm:$0xff] }
 0x617   :  { %v962_v27 = vpop.xlane.xlu1 %961  ;;  %v959_v28 = vpop.xlane.xlu0 %958 }
 0x618   :  { %v982_v29 = vsub.f32 %v950_v58, %v962_v27  ;;  %v981_v30 = vsub.f32 %v949_v62, %v959_v28  ;;  %v1150_v27 = vld [vmem:[#allocation8 + $0x1b8] sm:$0xff] }
 0x619   :  { %v1166_v28 = vpack.c.bf16 %v1150_v27, %v1149_v26 }
 0x61a   :  { %v991_v31 = vmul.f32 1.442695, %v982_v29  ;;  %v989_v32 = vmul.f32 1.442695, %v981_v30  ;;  %v1151_v29 = vld [vmem:[#allocation8 + $0x1c0] sm:$0xff]  ;;  %v1152_v30 = vld [vmem:[#allocation8 + $0x1c8] sm:$0xff] }
 0x61b   :  { %v968_v33 = vpop.xlane.xlu1 %967  ;;  %v965_v34 = vpop.xlane.xlu0 %964 }
 0x61c   :  { %2686 = vpow2.f32 %v991_v31  ;;  %v984_v35 = vsub.f32 %v952_v4, %v968_v33  ;;  %v983_v36 = vsub.f32 %v951_v2, %v965_v34  ;;  %v1167_v31 = vpack.c.bf16 %v1152_v30, %v1151_v29  ;;  %v1154_v33 = vld [vmem:[#allocation8 + $0x1d8] sm:$0xff] }
 0x61d   :  { %2688 = vpow2.f32 %v989_v32  ;;  %v1153_v32 = vld [vmem:[#allocation8 + $0x1d0] sm:$0xff] }
 0x61e   :  { %v995_v41 = vmul.f32 1.442695, %v984_v35  ;;  %v993_v43 = vmul.f32 1.442695, %v983_v36  ;;  %v1168_v34 = vpack.c.bf16 %v1154_v33, %v1153_v32 }
 0x61f   :  { %v974_v44 = vpop.xlane.xlu1 %973  ;;  %v971_v45 = vpop.xlane.xlu0 %970 }
 0x620   :  { %2690 = vpow2.f32 %v995_v41  ;;  %v986_v46 = vsub.f32 %v954_v17, %v974_v44  ;;  %v985_v47 = vsub.f32 %v953_v18, %v971_v45  ;;  %v1143_v17 = vld [vmem:[#allocation8 + $0x180] sm:$0xff]  ;;  %v1144_v18 = vld [vmem:[#allocation8 + $0x188] sm:$0xff] }
 0x621   :  { %2692 = vpow2.f32 %v993_v43  ;;  %v1163_v20 = vpack.c.bf16 %v1144_v18, %v1143_v17  ;;  %v1156_v17 = vld [vmem:[#allocation8 + $0x1e8] sm:$0xff] }
 0x622   :  { %v999_v48 = vmul.f32 1.442695, %v986_v46  ;;  %v997_v49 = vmul.f32 1.442695, %v985_v47 }
 0x623   :  { %v980_v50 = vpop.xlane.xlu1 %979  ;;  %v977_v51 = vpop.xlane.xlu0 %976  ;;  %2276 = vmatprep.subr.bf16.mxu0 %v1163_v20 }
 0x624   :  { %2694 = vpow2.f32 %v999_v48  ;;  %v988_v52 = vsub.f32 %v956_v23, %v980_v50  ;;  %v987_v53 = vsub.f32 %v955_v24, %v977_v51  ;;  %v1147_v23 = vld [vmem:[#allocation8 + $0x1a0] sm:$0xff]  ;;  %v1148_v24 = vld [vmem:[#allocation8 + $0x1a8] sm:$0xff]  ;;  %2277 = vmatpush3.bf16.msra.mxu0 %v1163_v20 }
 0x625   :  { %2696 = vpow2.f32 %v997_v49  ;;  %2278 = vmatprep.subr.bf16.mxu0 %v1164_v22  ;;  %v1165_v25 = vpack.c.bf16 %v1148_v24, %v1147_v23 }
 0x626   :  { %v3164_v61 = vpop.eup %2686  ;;  %v1003_v54 = vmul.f32 1.442695, %v988_v52  ;;  %v1001_v55 = vmul.f32 1.442695, %v987_v53 }
 0x627   :  { %v3166_v58 = vpop.eup %2688  ;;  %v1008_v62 = vsel %vm535_vm2, %v3164_v61, 0.0 }
 0x628   :  { %2698 = vpow2.f32 %v1003_v54  ;;  %1009 = vadd.xlane.f32.xlu1 %v1008_v62  ;;  %v1005_v63 = vsel %vm535_vm2, %v3166_v58, 0.0  ;;  %2279 = vmatpush3.bf16.msra.mxu0 %v1164_v22  ;;  %v1238_v22 = vsub.s32 6, %v3015_v59 }
 0x629   :  { %2700 = vpow2.f32 %v1001_v55  ;;  %1006 = vadd.xlane.f32.xlu0 %v1005_v63  ;;  %2280 = vmatprep.subr.bf16.mxu0 %v1165_v25 }
 0x62a   :  { %v3172_v1 = vpop.eup %2690 }
 0x62b   :  { %v3174_v3 = vpop.eup %2692  ;;  %v1014_v0 = vsel %vm535_vm2, %v3172_v1, 0.0 }
 0x62c   :  { %1015 = vadd.xlane.f32.xlu1 %v1014_v0  ;;  %v1011_v4 = vsel %vm535_vm2, %v3174_v3, 0.0  ;;  %2281 = vmatpush3.bf16.msra.mxu0 %v1165_v25 }
 0x62d   :  { %1012 = vadd.xlane.f32.xlu0 %v1011_v4  ;;  %2282 = vmatprep.subr.bf16.mxu0 %v1166_v28 }
 0x62e   :  { %v3180_v2 = vpop.eup %2694 }
 0x62f   :  { %v3182_v5 = vpop.eup %2696  ;;  %v1020_v6 = vsel %vm535_vm2, %v3180_v2, 0.0 }
 0x630   :  { %1021 = vadd.xlane.f32.xlu1 %v1020_v6  ;;  %v1017_v9 = vsel %vm535_vm2, %v3182_v5, 0.0  ;;  %2283 = vmatpush3.bf16.msra.mxu0 %v1166_v28 }
 0x631   :  { %1018 = vadd.xlane.f32.xlu0 %v1017_v9  ;;  %2284 = vmatprep.subr.bf16.mxu0 %v1167_v31 }
 0x632   :  { %v3188_v11 = vpop.eup %2698 }
 0x633   :  { %v3190_v12 = vpop.eup %2700  ;;  %v1026_v13 = vsel %vm535_vm2, %v3188_v11, 0.0 }
 0x634   :  { %1027 = vadd.xlane.f32.xlu1 %v1026_v13  ;;  %v1023_v14 = vsel %vm535_vm2, %v3190_v12, 0.0  ;;  %2285 = vmatpush3.bf16.msra.mxu0 %v1167_v31 }
 0x635   :  { %1024 = vadd.xlane.f32.xlu0 %v1023_v14  ;;  %2286 = vmatprep.subr.bf16.mxu0 %v1168_v34 }
 0x638   :  { %2287 = vmatpush3.bf16.msra.mxu0 %v1168_v34 }
 0x6b5   :  { %v1010_v35 = vpop.xlane.xlu1 %1009 }
 0x6b6   :  { %2702 = vrcp.f32 %v1010_v35  ;;  %v1007_v36 = vpop.xlane.xlu0 %1006 }
 0x6b7   :  { %2704 = vrcp.f32 %v1007_v36 }
 0x6b9   :  { %v1016_v41 = vpop.xlane.xlu1 %1015 }
 0x6ba   :  { %2706 = vrcp.f32 %v1016_v41  ;;  %v1013_v43 = vpop.xlane.xlu0 %1012 }
 0x6bb   :  { %2708 = vrcp.f32 %v1013_v43 }
 0x6bd   :  { %v1022_v44 = vpop.xlane.xlu1 %1021 }
 0x6be   :  { %2710 = vrcp.f32 %v1022_v44  ;;  %v1019_v45 = vpop.xlane.xlu0 %1018 }
 0x6bf   :  { %2712 = vrcp.f32 %v1019_v45 }
 0x6c0   :  { %v2703_v46 = vpop.eup %2702 }
 0x6c1   :  { %v2705_v47 = vpop.eup %2704  ;;  %v1028_v48 = vpop.xlane.xlu1 %1027  ;;  %v1038_v49 = vmul.f32 %v2703_v46, %v3164_v61 }
 0x6c2   :  { %2714 = vrcp.f32 %v1028_v48  ;;  %v1025_v50 = vpop.xlane.xlu0 %1024  ;;  %v1037_v51 = vmul.f32 %v2705_v47, %v3166_v58 }
 0x6c3   :  { %2716 = vrcp.f32 %v1025_v50 }
 0x6c4   :  { %v2707_v52 = vpop.eup %2706  ;;  %v1045_v53 = vpack.c.bf16 %v1038_v49, %v1037_v51 }
 0x6c5   :  { %v2709_v54 = vpop.eup %2708  ;;  %v1040_v55 = vmul.f32 %v2707_v52, %v3172_v1 }
 0x6c6   :  { %v1039_v62 = vmul.f32 %v2709_v54, %v3174_v3  ;;  %2268 = vmatprep.mubr.msk.bf16.mxu1 %vm535_vm2, %v1045_v53 }
 0x6c8   :  { %v2711_v63 = vpop.eup %2710  ;;  %v1046_v0 = vpack.c.bf16 %v1040_v55, %v1039_v62 }
 0x6c9   :  { %v2713_v4 = vpop.eup %2712  ;;  %v1042_v6 = vmul.f32 %v2711_v63, %v3180_v2  ;;  %v1155_v2 = vld [vmem:[#allocation8 + $0x1e0] sm:$0xff] }
 0x6ca   :  { %2269 = vmatmul.mubr.msk.bf16.vlgmr.msra.gmra.mrb[24].mxu1 %vm535_vm2, %v1046_v0  ;;  %v1041_v61 = vmul.f32 %v2713_v4, %v3182_v5  ;;  %v1169_v18 = vpack.c.bf16 %v1156_v17, %v1155_v2  ;;  %v1158_v5 = vld [vmem:[#allocation8 + $0x1f8] sm:$0xff] }
 0x6cb   :  { %v1170_v20 = vpack.c.bf16 %v1158_v5, %v1157_v19 }
 0x6cc   :  { %v2715_v58 = vpop.eup %2714  ;;  %v1047_v9 = vpack.c.bf16 %v1042_v6, %v1041_v61  ;;  %2288 = vmatprep.subr.bf16.mxu0 %v1169_v18 }
 0x6cd   :  { %v2717_v13 = vpop.eup %2716  ;;  %v1044_v14 = vmul.f32 %v2715_v58, %v3188_v11  ;;  %2289 = vmatpush3.bf16.msra.mxu0 %v1169_v18  ;;  %v1055_v11 = vsub.s32 2, %v3015_v59 }
 0x6ce   :  { %2272 = vmatprep.mubr.msk.bf16.mxu1 %vm535_vm2, %v1047_v9  ;;  %v1043_v1 = vmul.f32 %v2717_v13, %v3190_v12  ;;  %2290 = vmatprep.subr.bf16.mxu0 %v1170_v20  ;;  %v3212_v12 = vld [vmem:[#allocation10] sm:$0xff] }
 0x6cf   :  { %v1056_v21 = vrot.slane %v3212_v12, %v1055_v11  ;;  %v1239_v28 = vrot.slane %v3212_v12, %v1238_v22 }
 0x6d0   :  { %v1048_v3 = vpack.c.bf16 %v1044_v14, %v1043_v1  ;;  %v1265_v14 = vrot.slane %v3135_v10, 1 }
 0x6d1   :  { %2291 = vmatpush3.bf16.msra.mxu0 %v1170_v20 }
 0x6d2   :  { %2273 = vmatmul.mubr.msk.bf16.gmra.mrb[28].mxu1 %vm535_vm2, %v1048_v3  ;;  %2539 = vmatprep.subr.bf16.mxu0 %v2899_v56 }
 0x6d3   :  { %2316 = vmatprep.mubr.msk.f32.mxu1 %vm2900_vm0, %v2901_v57 }
 0x79d   :  { %v2270_v23 = vpop.f32.mrb[24].mxu1 }
 0x79e   :  { %v1112_v24 = vadd.f32 %v2270_v23, %v1056_v21  ;;  %v1103_v25 = vpop.f32.mrb[25].mxu1 }
 0x79f   :  { %v1104_v26 = vadd.f32 %v1103_v25, %v1056_v21  ;;  %v2271_v27 = vpop.f32.mrb[26].mxu1 }
 0x7a0   :  { %v1115_v29 = vadd.f32 %v2271_v27, %v1056_v21  ;;  %v1106_v30 = vpop.f32.mrb[27].mxu1  ;;  %v1136_v33 = vmax.f32 %v1112_v24, 0.0 }
 0x7a1   :  { %v1134_v31 = vmax.f32 %v1104_v26, 0.0  ;;  %v1107_v32 = vadd.f32 %v1106_v30, %v1056_v21 }
 0x7a2   :  { %v1137_v34 = vmax.f32 %v1115_v29, 0.0  ;;  %v1242_v50 = vmul.f32 %v1239_v28, %v1136_v33 }
 0x7a3   :  { %v1135_v35 = vmax.f32 %v1107_v32, 0.0  ;;  %v1240_v36 = vmul.f32 %v1239_v28, %v1134_v31 }
 0x7a4   :  { %v1160_v41 = vpack.c.bf16 %v1137_v34, %v1136_v33  ;;  %v1243_v55 = vmul.f32 %v1239_v28, %v1137_v34 }
 0x7a5   :  { %v1159_v43 = vpack.c.bf16 %v1135_v35, %v1134_v31  ;;  %v2274_v44 = vpop.f32.mrb[28].mxu1  ;;  %1248 = vadd.xlane.f32.xlu0 %v1240_v36  ;;  %v1241_v45 = vmul.f32 %v1239_v28, %v1135_v35 }
 0x7a6   :  { %v1128_v46 = vadd.f32 %v2274_v44, %v1056_v21  ;;  %v1119_v47 = vpop.f32.mrb[29].mxu1 }
 0x7a7   :  { %v1120_v48 = vadd.f32 %v1119_v47, %v1056_v21  ;;  %v2275_v49 = vpop.f32.mrb[30].mxu1  ;;  %1250 = vadd.xlane.f32.xlu1 %v1241_v45  ;;  %2292 = vmatprep.mubr.bf16.mxu0 %v1159_v43 }
 0x7a8   :  { %v1131_v51 = vadd.f32 %v2275_v49, %v1056_v21  ;;  %2517 = vmatpush3.bf16.xpose.msra.mxu1 %v1159_v43  ;;  %v1122_v52 = vpop.f32.mrb[31].mxu1  ;;  %2293 = vmatmul.mubr.bf16.vlgmr.msra.gmra.mrb[12].mxu0 %v1160_v41  ;;  %v1140_v62 = vmax.f32 %v1128_v46, 0.0 }
 0x7a9   :  { %v1138_v53 = vmax.f32 %v1120_v48, 0.0  ;;  %v1123_v54 = vadd.f32 %v1122_v52, %v1056_v21  ;;  %1252 = vadd.xlane.f32.xlu0 %v1242_v50  ;;  %2518 = vmatprep.subr.bf16.mxu1 %v2899_v56 }
 0x7aa   :  { %v1141_v63 = vmax.f32 %v1131_v51, 0.0  ;;  %v1246_v9 = vmul.f32 %v1239_v28, %v1140_v62 }
 0x7ab   :  { %v1139_v0 = vmax.f32 %v1123_v54, 0.0  ;;  %1254 = vadd.xlane.f32.xlu1 %v1243_v55  ;;  %v1244_v4 = vmul.f32 %v1239_v28, %v1138_v53 }
 0x7ac   :  { %v1162_v6 = vpack.c.bf16 %v1141_v63, %v1140_v62  ;;  %v1247_v13 = vmul.f32 %v1239_v28, %v1141_v63 }
 0x7ad   :  { %v1161_v61 = vpack.c.bf16 %v1139_v0, %v1138_v53  ;;  %1256 = vadd.xlane.f32.xlu0 %v1244_v4  ;;  %v1245_v58 = vmul.f32 %v1239_v28, %v1139_v0 }
 0x7af   :  { %1258 = vadd.xlane.f32.xlu1 %v1245_v58  ;;  %2296 = vmatprep.mubr.bf16.mxu0 %v1161_v61 }
 0x7b0   :  { %2520 = vmatpush3.bf16.xpose.msra.mxu1 %v1160_v41  ;;  %2297 = vmatmul.mubr.bf16.gmra.mrb[16].mxu0 %v1162_v6 }
 0x7b1   :  { %1260 = vadd.xlane.f32.xlu0 %v1246_v9  ;;  %2521 = vmatprep.subr.bf16.mxu1 %v2899_v56 }
 0x7b2   :  { %2386 = vmatprep.mubr.msk.f32.mxu0 %vm2900_vm0, %v2901_v57 }
 0x7b3   :  { %1262 = vadd.xlane.f32.xlu1 %v1247_v13 }
 0x7b8   :  { %2523 = vmatpush3.bf16.xpose.msra.mxu1 %v1161_v61 }
 0x7b9   :  { %2524 = vmatprep.subr.bf16.mxu1 %v2899_v56 }
 0x7c0   :  { %2526 = vmatpush3.bf16.xpose.msra.mxu1 %v1162_v6 }
 0x7c7   :  { %2317 = vmatmul.mubr.f32.vlgmr.msra.gmra.mrb[32].mxu1 %v1265_v14 }
 0x832   :  { %v1249_v10 = vpop.xlane.xlu0 %1248 }
 0x834   :  { %v1251_v25 = vpop.xlane.xlu1 %1250 }
 0x836   :  { %v1253_v26 = vpop.xlane.xlu0 %1252 }
 0x838   :  { %v1255_v27 = vpop.xlane.xlu1 %1254 }
 0x83a   :  { %v1257_v28 = vpop.xlane.xlu0 %1256 }
 0x83c   :  { %v1259_v29 = vpop.xlane.xlu1 %1258 }
 0x83e   :  { %v1261_v33 = vpop.xlane.xlu0 %1260 }
 0x840   :  { %v1263_v34 = vpop.xlane.xlu1 %1262 }
 0x87b   :  { %v2294_v1 = vpop.f32.mrb[12].mxu0 }
 0x87c   :  { %v1205_v3 = vpop.f32.mrb[13].mxu0 }
 0x87d   :  { %v2295_v2 = vpop.f32.mrb[14].mxu0 }
 0x87e   :  { %v1474_v17 = vpack.c.bf16 %v2295_v2, %v2294_v1  ;;  %v1208_v18 = vpop.f32.mrb[15].mxu0 }
 0x87f   :  { %v1473_v19 = vpack.c.bf16 %v1208_v18, %v1205_v3 }
 0x881   :  { %2319 = vmatprep.subr.bf16.mxu1 %v1473_v19 }
 0x882   :  { %2320 = vmatpush3.bf16.msra.mxu1 %v1473_v19 }
 0x883   :  { %v2298_v5 = vpop.f32.mrb[16].mxu0  ;;  %2321 = vmatprep.subr.bf16.mxu1 %v1474_v17 }
 0x884   :  { %v1221_v20 = vpop.f32.mrb[17].mxu0 }
 0x885   :  { %v2299_v21 = vpop.f32.mrb[18].mxu0 }
 0x886   :  { %v1476_v22 = vpack.c.bf16 %v2299_v21, %v2298_v5  ;;  %v1224_v23 = vpop.f32.mrb[19].mxu0  ;;  %2322 = vmatpush3.bf16.msra.mxu1 %v1474_v17 }
 0x887   :  { %v1475_v24 = vpack.c.bf16 %v1224_v23, %v1221_v20 }
 0x889   :  { %2323 = vmatprep.subr.bf16.mxu1 %v1475_v24 }
 0x88a   :  { %2324 = vmatpush3.bf16.msra.mxu1 %v1475_v24 }
 0x88b   :  { %2325 = vmatprep.subr.bf16.mxu1 %v1476_v22 }
 0x88e   :  { %2326 = vmatpush3.bf16.msra.mxu1 %v1476_v22 }
 0x88f   :  { %2527 = vmatprep.subr.bf16.mxu1 %v2899_v56 }
 0x89a   :  { %v1333_v30 = vpop.f32.mrb[32].mxu1 }
 0x89b   :  { %v1340_v31 = vrot.slane %v1333_v30, %v3018_v60  ;;  %v2318_v32 = vpop.f32.mrb[33].mxu1 }
 0x89d   :  { %v1342_v35 = vadd.f32 %v1340_v31, %v1251_v25  ;;  %v1341_v36 = vadd.f32 %v1340_v31, %v1249_v10  ;;  %v1344_v41 = vadd.f32 %v1340_v31, %v1255_v27  ;;  %v1343_v43 = vadd.f32 %v1340_v31, %v1253_v26 }
 0x89e   :  { %v1346_v44 = vadd.f32 %v1340_v31, %v1259_v29  ;;  %v1345_v45 = vadd.f32 %v1340_v31, %v1257_v28  ;;  %v1348_v46 = vadd.f32 %v1340_v31, %v1263_v34  ;;  %v1347_v47 = vadd.f32 %v1340_v31, %v1261_v33 }
 0x89f   :  { %vm1350_vm10 = vcmp.ge.f32.partialorder %v1342_v35, 0.0  ;;  %v1358_v48 = vmul.f32 0.2, %v1342_v35  ;;  %vm1349_vm11 = vcmp.ge.f32.partialorder %v1341_v36, 0.0  ;;  %v1357_v49 = vmul.f32 0.2, %v1341_v36 }
 0x8a0   :  { %vm1352_vm14 = vcmp.ge.f32.partialorder %v1344_v41, 0.0  ;;  %v1360_v50 = vmul.f32 0.2, %v1344_v41  ;;  %vm1351_vm15 = vcmp.ge.f32.partialorder %v1343_v43, 0.0  ;;  %v1359_v51 = vmul.f32 0.2, %v1343_v43 }
 0x8a1   :  { %v1366_v60 = vsel %vm1350_vm10, %v1342_v35, %v1358_v48  ;;  %v1365_v52 = vsel %vm1349_vm11, %v1341_v36, %v1357_v49  ;;  %vm1354_vm8 = vcmp.ge.f32.partialorder %v1346_v44, 0.0  ;;  %v1362_v53 = vmul.f32 0.2, %v1346_v44 }
 0x8a2   :  { %v1374_v54 = vsel %vm520_vm1, %v1366_v60, -1e+30  ;;  %v1373_v55 = vsel %vm519_vm3, %v1365_v52, -1e+30  ;;  %v1368_v62 = vsel %vm1352_vm14, %v1344_v41, %v1360_v50  ;;  %v1367_v63 = vsel %vm1351_vm15, %v1343_v43, %v1359_v51 }
 0x8a3   :  { %v1384_v0 = vsel %vm535_vm2, %v1374_v54, -inf  ;;  %v1381_v4 = vsel %vm535_vm2, %v1373_v55, -inf  ;;  %v1376_v6 = vsel %vm522_vm4, %v1368_v62, -1e+30  ;;  %v1375_v61 = vsel %vm521_vm5, %v1367_v63, -1e+30 }
 0x8a4   :  { %1385 = vmax.xlane.f32.xlu1 %v1384_v0  ;;  %1382 = vmax.xlane.f32.xlu0 %v1381_v4  ;;  %vm1353_vm9 = vcmp.ge.f32.partialorder %v1345_v45, 0.0  ;;  %v1370_v37 = vsel %vm1354_vm8, %v1346_v44, %v1362_v53  ;;  %v1361_v58 = vmul.f32 0.2, %v1345_v45  ;;  %vm1356_vm1 = vcmp.ge.f32.partialorder %v1348_v46, 0.0 }
 0x8a5   :  { %v1364_v38 = vmul.f32 0.2, %v1348_v46  ;;  %vm1355_vm3 = vcmp.ge.f32.partialorder %v1347_v47, 0.0  ;;  %v1363_v9 = vmul.f32 0.2, %v1347_v47  ;;  %v1390_v13 = vsel %vm535_vm2, %v1376_v6, -inf }
 0x8a6   :  { %v1387_v14 = vsel %vm535_vm2, %v1375_v61, -inf  ;;  %v1369_v1 = vsel %vm1353_vm9, %v1345_v45, %v1361_v58  ;;  %v1378_v39 = vsel %vm524_vm12, %v1370_v37, -1e+30 }
 0x8a7   :  { %v1377_v40 = vsel %vm523_vm13, %v1369_v1, -1e+30  ;;  %v1372_v3 = vsel %vm1356_vm1, %v1348_v46, %v1364_v38  ;;  %v1371_v2 = vsel %vm1355_vm3, %v1347_v47, %v1363_v9  ;;  %v1396_v17 = vsel %vm535_vm2, %v1378_v39, -inf }
 0x8a8   :  { %1391 = vmax.xlane.f32.xlu1 %v1390_v13  ;;  %1388 = vmax.xlane.f32.xlu0 %v1387_v14  ;;  %v1393_v18 = vsel %vm535_vm2, %v1377_v40, -inf  ;;  %v1380_v19 = vsel %vm526_vm6, %v1372_v3, -1e+30  ;;  %v1379_v5 = vsel %vm525_vm7, %v1371_v2, -1e+30 }
 0x8a9   :  { %v1402_v7 = vsel %vm535_vm2, %v1380_v19, -inf  ;;  %v1399_v20 = vsel %vm535_vm2, %v1379_v5, -inf }
 0x8ac   :  { %1397 = vmax.xlane.f32.xlu1 %v1396_v17  ;;  %1394 = vmax.xlane.f32.xlu0 %v1393_v18 }
 0x8b0   :  { %1403 = vmax.xlane.f32.xlu1 %v1402_v7  ;;  %1400 = vmax.xlane.f32.xlu0 %v1399_v20 }
 0x931   :  { %v1386_v8 = vpop.xlane.xlu1 %1385  ;;  %v1383_v21 = vpop.xlane.xlu0 %1382 }
 0x932   :  { %v1406_v22 = vsub.f32 %v1374_v54, %v1386_v8  ;;  %v1405_v23 = vsub.f32 %v1373_v55, %v1383_v21 }
 0x934   :  { %v1415_v24 = vmul.f32 1.442695, %v1406_v22  ;;  %v1413_v10 = vmul.f32 1.442695, %v1405_v23 }
 0x935   :  { %v1392_v25 = vpop.xlane.xlu1 %1391  ;;  %v1389_v26 = vpop.xlane.xlu0 %1388 }
 0x936   :  { %2718 = vpow2.f32 %v1415_v24  ;;  %v1408_v15 = vsub.f32 %v1376_v6, %v1392_v25  ;;  %v1407_v27 = vsub.f32 %v1375_v61, %v1389_v26 }
 0x937   :  { %2720 = vpow2.f32 %v1413_v10 }
 0x938   :  { %v1419_v16 = vmul.f32 1.442695, %v1408_v15  ;;  %v1417_v28 = vmul.f32 1.442695, %v1407_v27 }
 0x939   :  { %v1398_v29 = vpop.xlane.xlu1 %1397  ;;  %v1395_v30 = vpop.xlane.xlu0 %1394 }
 0x93a   :  { %2722 = vpow2.f32 %v1419_v16  ;;  %v1410_v31 = vsub.f32 %v1378_v39, %v1398_v29  ;;  %v1409_v32 = vsub.f32 %v1377_v40, %v1395_v30  ;;  %v1632_v16 = vld [vmem:[#allocation8 + $0x200] sm:$0xff]  ;;  %v1634_v29 = vld [vmem:[#allocation8 + $0x210] sm:$0xff] }
 0x93b   :  { %2724 = vpow2.f32 %v1417_v28  ;;  %v1633_v28 = vld [vmem:[#allocation8 + $0x208] sm:$0xff] }
 0x93c   :  { %v1423_v33 = vmul.f32 1.442695, %v1410_v31  ;;  %v1421_v34 = vmul.f32 1.442695, %v1409_v32  ;;  %v2540_v30 = vpack.c.bf16 %v1633_v28, %v1632_v16  ;;  %v1635_v31 = vld [vmem:[#allocation8 + $0x218] sm:$0xff]  ;;  %v1735_v16 = vld [vmem:[#allocation8 + $0x2c0] sm:$0xff] }
 0x93d   :  { %v1404_v35 = vpop.xlane.xlu1 %1403  ;;  %v1401_v36 = vpop.xlane.xlu0 %1400  ;;  %v2543_v32 = vpack.c.bf16 %v1635_v31, %v1634_v29  ;;  %v1736_v28 = vld [vmem:[#allocation8 + $0x2c8] sm:$0xff]  ;;  %v1738_v31 = vld [vmem:[#allocation8 + $0x2d8] sm:$0xff] }
 0x93e   :  { %2726 = vpow2.f32 %v1423_v33  ;;  %v1412_v41 = vsub.f32 %v1380_v19, %v1404_v35  ;;  %v1411_v43 = vsub.f32 %v1379_v5, %v1401_v36  ;;  %2541 = vmatpush3.bf16.msra.mxu0 %v2540_v30  ;;  %v1636_v33 = vld [vmem:[#allocation8 + $0x220] sm:$0xff]  ;;  %v1638_v36 = vld [vmem:[#allocation8 + $0x230] sm:$0xff]  ;;  %v2576_v29 = vpack.c.bf16 %v1736_v28, %v1735_v16 }
 0x93f   :  { %2728 = vpow2.f32 %v1421_v34  ;;  %2542 = vmatprep.subr.bf16.mxu0 %v2899_v56  ;;  %v1637_v34 = vld [vmem:[#allocation8 + $0x228] sm:$0xff]  ;;  %v1737_v30 = vld [vmem:[#allocation8 + $0x2d0] sm:$0xff] }
 0x940   :  { %v2719_v44 = vpop.eup %2718  ;;  %v1427_v45 = vmul.f32 1.442695, %v1412_v41  ;;  %v1425_v46 = vmul.f32 1.442695, %v1411_v43  ;;  %v2546_v35 = vpack.c.bf16 %v1637_v34, %v1636_v33  ;;  %v1639_v41 = vld [vmem:[#allocation8 + $0x238] sm:$0xff] }
 0x941   :  { %v2721_v47 = vpop.eup %2720  ;;  %v1432_v48 = vsel %vm535_vm2, %v2719_v44, 0.0  ;;  %v2549_v43 = vpack.c.bf16 %v1639_v41, %v1638_v36  ;;  %v1740_v36 = vld [vmem:[#allocation8 + $0x2e8] sm:$0xff] }
 0x942   :  { %2730 = vpow2.f32 %v1427_v45  ;;  %1433 = vadd.xlane.f32.xlu1 %v1432_v48  ;;  %v1429_v49 = vsel %vm535_vm2, %v2721_v47, 0.0  ;;  %2544 = vmatpush3.bf16.msra.mxu0 %v2543_v32  ;;  %v1641_v45 = vld [vmem:[#allocation8 + $0x248] sm:$0xff]  ;;  %v1643_v48 = vld [vmem:[#allocation8 + $0x258] sm:$0xff]  ;;  %v2579_v32 = vpack.c.bf16 %v1738_v31, %v1737_v30 }
 0x943   :  { %2732 = vpow2.f32 %v1425_v46  ;;  %1430 = vadd.xlane.f32.xlu0 %v1429_v49  ;;  %2545 = vmatprep.subr.bf16.mxu0 %v2899_v56 }
 0x944   :  { %v2723_v50 = vpop.eup %2722 }
 0x945   :  { %v2725_v51 = vpop.eup %2724  ;;  %v1438_v60 = vsel %vm535_vm2, %v2723_v50, 0.0 }
 0x946   :  { %1439 = vadd.xlane.f32.xlu1 %v1438_v60  ;;  %v1435_v52 = vsel %vm535_vm2, %v2725_v51, 0.0  ;;  %2547 = vmatpush3.bf16.msra.mxu0 %v2546_v35  ;;  %v1739_v35 = vld [vmem:[#allocation8 + $0x2e0] sm:$0xff] }
 0x947   :  { %1436 = vadd.xlane.f32.xlu0 %v1435_v52  ;;  %2548 = vmatprep.subr.bf16.mxu0 %v2899_v56  ;;  %v1646_v52 = vld [vmem:[#allocation8 + $0x270] sm:$0xff]  ;;  %v2582_v41 = vpack.c.bf16 %v1740_v36, %v1739_v35 }
 0x948   :  { %v2727_v53 = vpop.eup %2726 }
 0x949   :  { %v2729_v54 = vpop.eup %2728  ;;  %v1444_v55 = vsel %vm535_vm2, %v2727_v53, 0.0 }
 0x94a   :  { %1445 = vadd.xlane.f32.xlu1 %v1444_v55  ;;  %v1441_v62 = vsel %vm535_vm2, %v2729_v54, 0.0  ;;  %2550 = vmatpush3.bf16.msra.mxu0 %v2549_v43  ;;  %v1479_v55 = vsub.s32 3, %v3015_v59  ;;  %v1741_v43 = vld [vmem:[#allocation8 + $0x2f0] sm:$0xff] }
 0x94b   :  { %1442 = vadd.xlane.f32.xlu0 %v1441_v62  ;;  %2551 = vmatprep.subr.bf16.mxu0 %v2899_v56 }
 0x94c   :  { %v2731_v63 = vpop.eup %2730  ;;  %v1480_v62 = vrot.slane %v3212_v12, %v1479_v55 }
 0x94d   :  { %v2733_v0 = vpop.eup %2732  ;;  %v1450_v4 = vsel %vm535_vm2, %v2731_v63, 0.0 }
 0x94e   :  { %1451 = vadd.xlane.f32.xlu1 %v1450_v4  ;;  %v1447_v6 = vsel %vm535_vm2, %v2733_v0, 0.0 }
 0x94f   :  { %1448 = vadd.xlane.f32.xlu0 %v1447_v6 }
 0x9cf   :  { %v1434_v61 = vpop.xlane.xlu1 %1433 }
 0x9d0   :  { %2734 = vrcp.f32 %v1434_v61  ;;  %v1431_v37 = vpop.xlane.xlu0 %1430 }
 0x9d1   :  { %2736 = vrcp.f32 %v1431_v37 }
 0x9d3   :  { %v1440_v58 = vpop.xlane.xlu1 %1439 }
 0x9d4   :  { %2738 = vrcp.f32 %v1440_v58  ;;  %v1437_v38 = vpop.xlane.xlu0 %1436 }
 0x9d5   :  { %2740 = vrcp.f32 %v1437_v38 }
 0x9d7   :  { %v1446_v9 = vpop.xlane.xlu1 %1445 }
 0x9d8   :  { %2742 = vrcp.f32 %v1446_v9  ;;  %v1443_v13 = vpop.xlane.xlu0 %1442 }
 0x9d9   :  { %2744 = vrcp.f32 %v1443_v13 }
 0x9da   :  { %v2735_v14 = vpop.eup %2734 }
 0x9db   :  { %v2737_v1 = vpop.eup %2736  ;;  %v1452_v39 = vpop.xlane.xlu1 %1451  ;;  %v1462_v40 = vmul.f32 %v2735_v14, %v2719_v44  ;;  %v1640_v44 = vld [vmem:[#allocation8 + $0x240] sm:$0xff] }
 0x9dc   :  { %2746 = vrcp.f32 %v1452_v39  ;;  %v1449_v3 = vpop.xlane.xlu0 %1448  ;;  %v1461_v2 = vmul.f32 %v2737_v1, %v2721_v47  ;;  %v2552_v46 = vpack.c.bf16 %v1641_v45, %v1640_v44  ;;  %v1642_v47 = vld [vmem:[#allocation8 + $0x250] sm:$0xff]  ;;  %v1742_v44 = vld [vmem:[#allocation8 + $0x2f8] sm:$0xff] }
 0x9dd   :  { %2748 = vrcp.f32 %v1449_v3  ;;  %v2555_v49 = vpack.c.bf16 %v1643_v48, %v1642_v47  ;;  %v2585_v45 = vpack.c.bf16 %v1742_v44, %v1741_v43  ;;  %v1823_v47 = vld [vmem:[#allocation8 + $0x308] sm:$0xff]  ;;  %v1824_v48 = vld [vmem:[#allocation8 + $0x310] sm:$0xff] }
 0x9de   :  { %v2739_v17 = vpop.eup %2738  ;;  %v1469_v18 = vpack.c.bf16 %v1462_v40, %v1461_v2  ;;  %2553 = vmatpush3.bf16.msra.mxu0 %v2552_v46  ;;  %v1822_v46 = vld [vmem:[#allocation8 + $0x300] sm:$0xff] }
 0x9df   :  { %v2741_v19 = vpop.eup %2740  ;;  %v1464_v5 = vmul.f32 %v2739_v17, %v2723_v50  ;;  %2554 = vmatprep.subr.bf16.mxu0 %v2899_v56  ;;  %v1644_v50 = vld [vmem:[#allocation8 + $0x260] sm:$0xff] }
 0x9e0   :  { %v1463_v7 = vmul.f32 %v2741_v19, %v2725_v51  ;;  %2327 = vmatprep.mubr.msk.bf16.mxu1 %vm535_vm2, %v1469_v18  ;;  %v1645_v51 = vld [vmem:[#allocation8 + $0x268] sm:$0xff] }
 0x9e1   :  { %v2558_v60 = vpack.c.bf16 %v1645_v51, %v1644_v50  ;;  %v1825_v50 = vld [vmem:[#allocation8 + $0x318] sm:$0xff] }
 0x9e2   :  { %v2743_v20 = vpop.eup %2742  ;;  %v1470_v8 = vpack.c.bf16 %v1464_v5, %v1463_v7  ;;  %2556 = vmatpush3.bf16.msra.mxu0 %v2555_v49  ;;  %v104_v5 = vld [vmem:[#allocation7] sm:$0xff]  ;;  %v1727_v7 = vld [vmem:[#allocation8 + $0x280] sm:$0xff]  ;;  %v2588_v49 = vpack.c.bf16 %v1823_v47, %v1822_v46  ;;  %v2591_v51 = vpack.c.bf16 %v1825_v50, %v1824_v48 }
 0x9e3   :  { %v2745_v21 = vpop.eup %2744  ;;  %v1466_v22 = vmul.f32 %v2743_v20, %v2727_v53  ;;  %2557 = vmatprep.subr.bf16.mxu0 %v2899_v56  ;;  %v1647_v53 = vld [vmem:[#allocation8 + $0x278] sm:$0xff]  ;;  %v1728_v20 = vld [vmem:[#allocation8 + $0x288] sm:$0xff] }
 0x9e4   :  { %2328 = vmatmul.mubr.msk.bf16.vlgmr.msra.gmra.mrb[36].mxu1 %vm535_vm2, %v1470_v8  ;;  %v1465_v23 = vmul.f32 %v2745_v21, %v2729_v54  ;;  %v2561_v54 = vpack.c.bf16 %v1647_v53, %v1646_v52  ;;  %v1729_v8 = vld [vmem:[#allocation8 + $0x290] sm:$0xff]  ;;  %v2564_v21 = vpack.c.bf16 %v1728_v20, %v1727_v7 }
 0x9e5   :  { %v1828_v53 = vld [vmem:[#allocation8 + $0x330] sm:$0xff] }
 0x9e6   :  { %v2747_v24 = vpop.eup %2746  ;;  %v1471_v10 = vpack.c.bf16 %v1466_v22, %v1465_v23  ;;  %2559 = vmatpush3.bf16.msra.mxu0 %v2558_v60  ;;  %v1730_v22 = vld [vmem:[#allocation8 + $0x298] sm:$0xff]  ;;  %v1827_v60 = vld [vmem:[#allocation8 + $0x328] sm:$0xff] }
 0x9e7   :  { %v2749_v25 = vpop.eup %2748  ;;  %v1468_v26 = vmul.f32 %v2747_v24, %v2731_v63  ;;  %2560 = vmatprep.subr.bf16.mxu0 %v2899_v56  ;;  %v2567_v23 = vpack.c.bf16 %v1730_v22, %v1729_v8  ;;  %v1731_v24 = vld [vmem:[#allocation8 + $0x2a0] sm:$0xff] }
 0x9e8   :  { %2331 = vmatprep.mubr.msk.bf16.mxu1 %vm535_vm2, %v1471_v10  ;;  %v1467_v15 = vmul.f32 %v2749_v25, %v2733_v0  ;;  %v1732_v10 = vld [vmem:[#allocation8 + $0x2a8] sm:$0xff] }
 0x9e9   :  { %v2570_v25 = vpack.c.bf16 %v1732_v10, %v1731_v24 }
 0x9ea   :  { %v1472_v27 = vpack.c.bf16 %v1468_v26, %v1467_v15  ;;  %2562 = vmatpush3.bf16.msra.mxu0 %v2561_v54  ;;  %v1733_v26 = vld [vmem:[#allocation8 + $0x2b0] sm:$0xff]  ;;  %v1734_v15 = vld [vmem:[#allocation8 + $0x2b8] sm:$0xff] }
 0x9eb   :  { %2587 = vmatprep.subr.bf16.mxu0 %v2899_v56  ;;  %v1829_v54 = vld [vmem:[#allocation8 + $0x338] sm:$0xff] }
 0x9ec   :  { %2332 = vmatmul.mubr.msk.bf16.gmra.mrb[40].mxu1 %vm535_vm2, %v1472_v27  ;;  %v2573_v27 = vpack.c.bf16 %v1734_v15, %v1733_v26 }
 0x9ed   :  { %2351 = vmatprep.mubr.msk.f32.mxu1 %vm2900_vm0, %v2901_v57 }
 0xab7   :  { %v2329_v63 = vpop.f32.mrb[36].mxu1 }
 0xab8   :  { %v1527_v0 = vpop.f32.mrb[37].mxu1  ;;  %v1536_v6 = vadd.f32 %v2329_v63, %v1480_v62  ;;  %v1830_v63 = vld [vmem:[#allocation8 + $0x340] sm:$0xff] }
 0xab9   :  { %v2330_v4 = vpop.f32.mrb[38].mxu1  ;;  %v1528_v58 = vadd.f32 %v1527_v0, %v1480_v62  ;;  %v1831_v0 = vld [vmem:[#allocation8 + $0x348] sm:$0xff] }
 0xaba   :  { %v1539_v61 = vadd.f32 %v2330_v4, %v1480_v62  ;;  %v1530_v37 = vpop.f32.mrb[39].mxu1  ;;  %v2600_v4 = vpack.c.bf16 %v1831_v0, %v1830_v63 }
 0xabb   :  { %v1531_v38 = vadd.f32 %v1530_v37, %v1480_v62 }
 0xabc   :  { %v2531_v9 = vpack.c.bf16 %v1539_v61, %v1536_v6  ;;  %v1832_v6 = vld [vmem:[#allocation8 + $0x350] sm:$0xff]  ;;  %v1833_v61 = vld [vmem:[#allocation8 + $0x358] sm:$0xff] }
 0xabd   :  { %v2528_v13 = vpack.c.bf16 %v1531_v38, %v1528_v58  ;;  %v2603_v37 = vpack.c.bf16 %v1833_v61, %v1832_v6  ;;  %v2751_v58 = vld [vmem:[#allocation10 + $0x8] sm:$0xff] }
 0xabe   :  { %v1651_v38 = vrot.slane %v2751_v58, %v1055_v11  ;;  %v1746_v11 = vrot.slane %v2751_v58, %v1479_v55 }
 0xabf   :  { %v2333_v14 = vpop.f32.mrb[40].mxu1  ;;  %2529 = vmatpush3.bf16.msra.mxu1 %v2528_v13 }
 0xac0   :  { %v1543_v1 = vpop.f32.mrb[41].mxu1  ;;  %2530 = vmatprep.subr.bf16.mxu1 %v2899_v56  ;;  %v1552_v40 = vadd.f32 %v2333_v14, %v1480_v62 }
 0xac1   :  { %v2334_v39 = vpop.f32.mrb[42].mxu1  ;;  %v1544_v12 = vadd.f32 %v1543_v1, %v1480_v62 }
 0xac2   :  { %v1555_v3 = vadd.f32 %v2334_v39, %v1480_v62  ;;  %v1546_v2 = vpop.f32.mrb[43].mxu1 }
 0xac3   :  { %v1547_v17 = vadd.f32 %v1546_v2, %v1480_v62  ;;  %2532 = vmatpush3.bf16.msra.mxu1 %v2531_v9  ;;  %v2597_v62 = vpack.c.bf16 %v1829_v54, %v1828_v53  ;;  %v1835_v2 = vld [vmem:[#allocation8 + $0x368] sm:$0xff] }
 0xac4   :  { %v2537_v18 = vpack.c.bf16 %v1555_v3, %v1552_v40  ;;  %2533 = vmatprep.subr.bf16.mxu1 %v2899_v56  ;;  %v1834_v3 = vld [vmem:[#allocation8 + $0x360] sm:$0xff] }
 0xac5   :  { %v2534_v19 = vpack.c.bf16 %v1547_v17, %v1544_v12  ;;  %v2606_v12 = vpack.c.bf16 %v1835_v2, %v1834_v3  ;;  %v1836_v17 = vld [vmem:[#allocation8 + $0x370] sm:$0xff] }
 0xac7   :  { %2535 = vmatpush3.bf16.msra.mxu1 %v2534_v19 }
 0xac8   :  { %2536 = vmatprep.subr.bf16.mxu1 %v2899_v56 }
 0xacb   :  { %2538 = vmatpush3.bf16.msra.mxu1 %v2537_v18  ;;  %v1837_v18 = vld [vmem:[#allocation8 + $0x378] sm:$0xff] }
 0xacc   :  { %2563 = vmatprep.subr.bf16.mxu1 %v2899_v56  ;;  %v2609_v19 = vpack.c.bf16 %v1837_v18, %v1836_v17 }
 0xace   :  { %2352 = vmatmul.mubr.msk.f32.vlgmr.msra.gmra.mrb[34].mxu1 %vm535_vm2, %v104_v5 }
 0xacf   :  { %2421 = vmatprep.mubr.msk.f32.mxu1 %vm2900_vm0, %v2901_v57  ;;  %2565 = vmatpush3.bf16.msra.mxu1 %v2564_v21 }
 0xad0   :  { %2566 = vmatprep.subr.bf16.mxu1 %v2899_v56 }
 0xad3   :  { %2568 = vmatpush3.bf16.msra.mxu1 %v2567_v23  ;;  %v1841_v23 = vrot.slane %v2751_v58, %v384_v42 }
 0xad4   :  { %2569 = vmatprep.subr.bf16.mxu1 %v2899_v56 }
 0xad7   :  { %2571 = vmatpush3.bf16.msra.mxu1 %v2570_v25 }
 0xad8   :  { %2572 = vmatprep.subr.bf16.mxu1 %v2899_v56 }
 0xadb   :  { %2574 = vmatpush3.bf16.msra.mxu1 %v2573_v27 }
 0xadc   :  { %2575 = vmatprep.subr.bf16.mxu1 %v2899_v56 }
 0xadf   :  { %2577 = vmatpush3.bf16.msra.mxu1 %v2576_v29 }
 0xae0   :  { %2578 = vmatprep.subr.bf16.mxu1 %v2899_v56 }
 0xae3   :  { %2580 = vmatpush3.bf16.msra.mxu1 %v2579_v32 }
 0xae4   :  { %2581 = vmatprep.subr.bf16.mxu1 %v2899_v56 }
 0xae7   :  { %2583 = vmatpush3.bf16.msra.mxu1 %v2582_v41 }
 0xae8   :  { %2584 = vmatprep.subr.bf16.mxu1 %v2899_v56 }
 0xaeb   :  { %2586 = vmatpush3.bf16.msra.mxu1 %v2585_v45 }
 0xba1   :  { %v1627_v33 = vpop.f32.mrb[34].mxu1 }
 0xba2   :  { %v2353_v34 = vpop.f32.mrb[35].mxu1  ;;  %2387 = vmatmul.mubr.f32.vlgmr.msra.gmra.mrb[20].mxu0 %v1627_v33 }
 0xba3   :  { %2456 = vmatprep.mubr.msk.f32.mxu0 %vm2900_vm0, %v2901_v57  ;;  %2589 = vmatpush3.bf16.msra.mxu0 %v2588_v49  ;;  %v1826_v57 = vld [vmem:[#allocation8 + $0x320] sm:$0xff] }
 0xba4   :  { %2590 = vmatprep.subr.bf16.mxu0 %v2899_v56  ;;  %v2594_v52 = vpack.c.bf16 %v1827_v60, %v1826_v57 }
 0xba7   :  { %2592 = vmatpush3.bf16.msra.mxu0 %v2591_v51 }
 0xba8   :  { %2593 = vmatprep.subr.bf16.mxu0 %v2899_v56 }
 0xbab   :  { %2595 = vmatpush3.bf16.msra.mxu0 %v2594_v52 }
 0xbac   :  { %2596 = vmatprep.subr.bf16.mxu0 %v2899_v56 }
 0xbaf   :  { %2598 = vmatpush3.bf16.msra.mxu0 %v2597_v62 }
 0xbb0   :  { %2599 = vmatprep.subr.bf16.mxu0 %v2899_v56 }
 0xbb3   :  { %2601 = vmatpush3.bf16.msra.mxu0 %v2600_v4 }
 0xbb4   :  { %2602 = vmatprep.subr.bf16.mxu0 %v2899_v56 }
 0xbb7   :  { %2604 = vmatpush3.bf16.msra.mxu0 %v2603_v37 }
 0xbb8   :  { %2605 = vmatprep.subr.bf16.mxu0 %v2899_v56 }
 0xbbb   :  { %2607 = vmatpush3.bf16.msra.mxu0 %v2606_v12 }
 0xbbc   :  { %2608 = vmatprep.subr.bf16.mxu0 %v2899_v56 }
 0xbbf   :  { %2610 = vmatpush3.bf16.msra.mxu0 %v2609_v19 }
 0xc75   :  { %v1718_v9 = vpop.f32.mrb[20].mxu0 }
 0xc76   :  { %v1719_v13 = vadd.f32 %v1718_v9, %v1651_v38  ;;  %v2388_v14 = vpop.f32.mrb[21].mxu0 }
 0xc78   :  { %vm1722_vm0 = vcmp.ge.f32.partialorder %v1719_v13, 0.0  ;;  %v1723_v1 = vmul.f32 0.01, %v1719_v13 }
 0xc7a   :  { %v1724_v39 = vsel %vm1722_vm0, %v1719_v13, %v1723_v1 }
 0xc7b   :  { %v1725_v40 = vmul.f32 0.999995, %v1724_v39 }
 0xc7d   :  { %2422 = vmatmul.mubr.f32.vlgmr.msra.gmra.mrb[44].mxu1 %v1725_v40 }
 0xd50   :  { %v1813_v5 = vpop.f32.mrb[44].mxu1 }
 0xd51   :  { %v1814_v7 = vadd.f32 %v1813_v5, %v1746_v11  ;;  %v2423_v20 = vpop.f32.mrb[45].mxu1 }
 0xd53   :  { %vm1817_vm2 = vcmp.ge.f32.partialorder %v1814_v7, 0.0  ;;  %v1818_v8 = vmul.f32 0.01, %v1814_v7 }
 0xd55   :  { %v1819_v21 = vsel %vm1817_vm2, %v1814_v7, %v1818_v8 }
 0xd56   :  { %v1820_v22 = vmul.f32 0.999995, %v1819_v21 }
 0xd58   :  { %2457 = vmatmul.mubr.f32.vlgmr.msra.gmra.mrb[22].mxu0 %v1820_v22 }
 0xe2b   :  { %v1908_v24 = vpop.f32.mrb[22].mxu0 }
 0xe2c   :  { %v1909_v10 = vadd.f32 %v1908_v24, %v1841_v23  ;;  %v2458_v56 = vpop.f32.mrb[23].mxu0 }
 0xe2e   :  { %1912 = vst [vmem:[#allocation11] sm:$0xff] %v1909_v10 }
 0xe2f   :  { %2873 = shalt.err (!%p2870_p2)
}
 0xe30   :  { %s2874_s3 = scalar_lea.hbm %s3323_s5, 128 }
 0xe31   :  { %p2875_p3 = scmp.ne.s32.totalorder %s3323_s5, %s2874_s3  ;;  %p2878_p4 = scmp.lt.u32.totalorder %s2874_s3, %s3323_s5 }
 0xe33   :  { %p2880_p5 = pnand %p2878_p4, %p2875_p3 }
 0xe35   :  { %2883 = shalt.err (!%p2880_p5)
}
 0xe36   :  { %1922 = dma.vmem_to_hbm [thread:$0]  %s1920_s30, 128, %s3323_s5, [#allocation4]  }
 0xe37   :  { %2890 = dma.done.wait [#allocation4], 128  }
 0xe38   :  { %2891 = vsyncadd [#allocation4], 4294967168 }
 0xe39   :  { %1926 = vsyncpa [#allocation3], 1 }
 0xe3a   :  { %1927 = vsyncpa [#allocation6], 1 }
 0xe3b   :  { %1928 = vsyncpa [#allocation9], 1 }
 0xe3c   :  { %1929 = vsyncpa [#allocation4], 1 }

</bundles_post_ra>
